<compile_context>
chip_gen: v6e
topology: v6e:2x2x1
jax: 0.10.0
libtpu: 0.0.40
codegen_flags: <defaults>
</compile_context>

<pallas_src>
import functools

import jax
import jax.numpy as jnp
from jax.experimental import pallas as pl
from jax.experimental.pallas import tpu as pltpu


def _cnn_block_kernel(x_ref, wf_ref, s_ref, b_ref, o_ref, xpad_ref, *,
                      H, W, Cin, Cout, TH, Wp, compute_dtype):
    """One (image, row-strip) grid step of conv3x3('same') -> BN(eval) -> ReLU6.

    x_ref    : (1, H, W, Cin)    whole unpadded image (NHWC)
    wf_ref   : (9*Cin, Cout)     conv weight, HWIO flattened to (kh*kw*ci, co)
    s_ref    : (1, Cout)         folded BN scale
    b_ref    : (1, Cout)         folded BN bias (conv bias folded in)
    o_ref    : (1, TH, W*Cout)   output row strip, lane-dense
    xpad_ref : (H+2, Wp, Cin)    VMEM scratch: row-haloed copy of the image,
                                 image at width offset 0, cols [W, Wp) zero
    """
    s = pl.program_id(1)

    # ---- build the haloed image once per image (first strip only). ----------
    # Rows are shifted by +1 (leading axis -> cheap); width stays at offset 0 so
    # the big interior copy is sublane-aligned.  Only the two halo rows and the
    # right zero-pad columns are zeroed; the interior is fully overwritten.
    # Scratch persists across the (inner, 'arbitrary') strip axis.
    @pl.when(s == 0)
    def _():
        zdt = xpad_ref.dtype
        xpad_ref[0:1] = jnp.zeros((1, Wp, Cin), zdt)                  # top halo row
        xpad_ref[H + 1:H + 2] = jnp.zeros((1, Wp, Cin), zdt)          # bottom halo row
        xpad_ref[:, W:Wp, :] = jnp.zeros((H + 2, Wp - W, Cin), zdt)   # right zero cols
        xpad_ref[1:H + 1, 0:W, :] = x_ref[0]                          # aligned interior

    # ---- (TH+2)-row input window for this output row strip. -----------------
    r0 = pl.multiple_of(s * TH, TH)
    xs = xpad_ref[pl.ds(r0, TH + 2)]                 # (TH+2, Wp, Cin)
    n_rows = (TH + 2) * Wp
    xsf = xs.reshape(n_rows, Cin)                    # free merge: Wp % 8 == 0

    # ---- im2col: 2 sublane rolls for the dw = -1/+1 column shifts; dh shifts
    # are sublane-ALIGNED slices (offsets dh*Wp, Wp % 8 == 0).
    # tap(dh,dw)[h*Wp+w] == xpad[r0+h+dh, w+dw-1]; the only wrap-around for a
    # kept output column (w < W) is (h=0,dh=0,w=0,dw=0) -> xsf[n_rows-1], which
    # lands in the zeroed right-pad columns, i.e. the required left zero pad.
    rolled = [pltpu.roll(xsf, 1, axis=0),            # dw=0: tap[i] = xsf[i-1]
              xsf,                                   # dw=1: identity
              pltpu.roll(xsf, n_rows - 1, axis=0)]   # dw=2: tap[i] = xsf[i+1]
    rows3 = jnp.concatenate(rolled, axis=1)          # (n_rows, 3*Cin), cols (dw, ci)
    patch = jnp.concatenate(
        [rows3[dh * Wp:dh * Wp + TH * Wp] for dh in range(3)],
        axis=1)                                      # (TH*Wp, 9*Cin), cols (dh, dw, ci)

    # ---- one MXU matmul with K = 9*Cin, then folded-BN affine + ReLU6 (f32). -
    acc = jnp.dot(patch.astype(compute_dtype),
                  wf_ref[...].astype(compute_dtype),
                  preferred_element_type=jnp.float32)        # (TH*Wp, Cout) f32
    y = acc * s_ref[...] + b_ref[...]
    y = jnp.clip(y, 0.0, 6.0)

    # ---- trim width padding and store lane-dense (TH, W*Cout). ---------------
    y = y.reshape(TH, Wp, Cout)[:, :W, :]            # free split; offset-0 trim
    o_ref[...] = y.reshape(1, TH, W * Cout).astype(o_ref.dtype)


def _pick_tile_h(H, W, Cin, Cout, budget_bytes=20 << 20):
    """Largest row-strip height TH (divisor of H, multiple of 8, or H itself)
    whose per-step working set fits the VMEM budget."""
    Wp = ((W + 2 + 7) // 8) * 8

    def est(th):
        scratch = (H + 2) * Wp * Cin * 4                    # haloed image scratch
        window = 5 * (th + 2) * Wp * Cin * 4                # xs + 2 rolls + rows3 (~)
        patch = th * Wp * (9 * Cin + 2 * Cout) * 4          # patch + acc + y
        io = 2 * H * W * Cin * 4 + 2 * th * W * Cout * 4    # double-buffered in/out
        return scratch + window + patch + io

    if H % 8 != 0:
        return H                                            # single full-height strip
    for th in range(H, 7, -8):
        if H % th == 0 and est(th) <= budget_bytes:
            return th
    return 8


def cnn_block_forward(x_nchw, params, *, compute_dtype=jnp.float32):
    """PyTorch-style NCHW in/out: Conv2d(3x3, same) + BatchNorm2d(eval) + ReLU6."""
    x = jnp.transpose(x_nchw, (0, 2, 3, 1)).astype(jnp.float32)   # -> NHWC (once)
    N, H, W, Cin = x.shape
    Cout = params["s"].shape[-1]

    TH = _pick_tile_h(H, W, Cin, Cout)     # row-strip height (sublane multiple or H)
    S = H // TH
    Wp = ((W + 2 + 7) // 8) * 8            # padded width rounded to sublane tile

    kernel = functools.partial(_cnn_block_kernel, H=H, W=W, Cin=Cin, Cout=Cout,
                               TH=TH, Wp=Wp, compute_dtype=compute_dtype)

    out2d = pl.pallas_call(
        kernel,
        out_shape=jax.ShapeDtypeStruct((N, H, W * Cout), jnp.float32),
        grid_spec=pltpu.PrefetchScalarGridSpec(
            num_scalar_prefetch=0,
            grid=(N, S),
            in_specs=[
                # Whole unpadded image; index map ignores the strip axis, so it
                # is DMA'd once per image (no wrapper-side jnp.pad round trip).
                pl.BlockSpec((1, H, W, Cin), lambda n, s: (n, 0, 0, 0)),
                pl.BlockSpec((9 * Cin, Cout), lambda n, s: (0, 0)),   # weights
                pl.BlockSpec((1, Cout), lambda n, s: (0, 0)),         # BN scale
                pl.BlockSpec((1, Cout), lambda n, s: (0, 0)),         # BN bias
            ],
            out_specs=pl.BlockSpec((1, TH, W * Cout), lambda n, s: (n, s, 0)),
            scratch_shapes=[pltpu.VMEM((H + 2, Wp, Cin), jnp.float32)],
        ),
        compiler_params=pltpu.CompilerParams(
            dimension_semantics=("parallel", "arbitrary"),
            vmem_limit_bytes=32 * 1024 * 1024,   # v5e scoped default is only 16 MiB
        ),
    )(x, params["wf"], params["s"], params["b"])

    out = out2d.reshape(N, H, W, Cout)             # free split of trailing lanes
    return jnp.transpose(out, (0, 3, 1, 2))        # -> NCHW


def init_params(key, in_ch, out_ch, eps=1e-5):
    ks = jax.random.split(key, 6)
    w = 0.1 * jax.random.normal(ks[0], (3, 3, in_ch, out_ch), jnp.float32)  # HWIO
    cb = 0.05 * jax.random.normal(ks[1], (out_ch,), jnp.float32)
    g = 1.0 + 0.1 * jax.random.normal(ks[2], (out_ch,), jnp.float32)
    beta = 0.05 * jax.random.normal(ks[3], (out_ch,), jnp.float32)
    m = 0.05 * jax.random.normal(ks[4], (out_ch,), jnp.float32)
    v = 1.0 + 0.1 * jax.random.uniform(ks[5], (out_ch,), jnp.float32)
    # Fold conv-bias + eval-mode BN into per-channel scale/bias:
    #   y = scale * conv(x) + bias,  scale = g/sqrt(v+eps),
    #   bias = beta + scale*(conv_bias - mean)
    scale = g / jnp.sqrt(v + eps)
    return {
        "w": w, "cb": cb, "g": g, "beta": beta, "m": m, "v": v,
        "wf": w.reshape(9 * in_ch, out_ch),           # (kh*kw*cin, cout) for K=9*Cin matmul
        "s": scale.reshape(1, out_ch),
        "b": (beta + scale * (cb - m)).reshape(1, out_ch),
    }


def ref_forward(x_nchw, p, eps=1e-5):
    """Pure-JAX reference (lax conv, explicit eval-mode BN, ReLU6)."""
    x = jnp.transpose(x_nchw, (0, 2, 3, 1))
    h = jax.lax.conv_general_dilated(
        x, p["w"], window_strides=(1, 1), padding="SAME",
        dimension_numbers=("NHWC", "HWIO", "NHWC")) + p["cb"]
    h = (h - p["m"]) / jnp.sqrt(p["v"] + eps) * p["g"] + p["beta"]
    h = jnp.clip(h, 0.0, 6.0)
    return jnp.transpose(h, (0, 3, 1, 2))


if __name__ == "__main__":
    key = jax.random.PRNGKey(0)
    kx, kp = jax.random.split(key)
    N, Cin, H, W = 2, 4, 16, 16
    Cout = 8
    x = jax.random.normal(kx, (N, Cin, H, W), dtype=jnp.float32)
    params = init_params(kp, Cin, Cout)

    y = cnn_block_forward(x, params)          # compute_dtype=jnp.bfloat16 on v6e/v7x
    y = jax.block_until_ready(y)

    y_ref = ref_forward(x, params)
    err = float(jnp.max(jnp.abs(y - y_ref)))
    assert y.shape == (N, Cout, H, W) and y.dtype == jnp.float32
    assert err < 1e-4, f"mismatch vs reference, max abs err = {err}"
    print("KERNEL_OK")
</pallas_src>

<mosaic_0001>
module attributes {stable_mosaic.version = 11 : i64} {
  func.func @_cnn_block_kernel(%arg0: i32, %arg1: i32, %arg2: memref<1x16x16x4xf32, #tpu.memory_space<vmem>>, %arg3: memref<36x8xf32, #tpu.memory_space<vmem>>, %arg4: memref<1x8xf32, #tpu.memory_space<vmem>>, %arg5: memref<1x8xf32, #tpu.memory_space<vmem>>, %arg6: memref<1x16x128xf32, #tpu.memory_space<vmem>>, %arg7: memref<18x24x4xf32, #tpu.memory_space<vmem>>) attributes {dimension_semantics = [#tpu.dimension_semantics<parallel>, #tpu.dimension_semantics<arbitrary>], iteration_bounds = array<i64: 2, 1>, scalar_prefetch = 0 : i64, scratch_operands = 1 : i64, tpu.core_type = #tpu.core_type<tc>, window_params = [{transform_indices = @transform_0, window_bounds = array<i64: 1, 16, 16, 4>}, {pipeline_mode = #tpu.pipeline_mode<synchronous>, transform_indices = @transform_1, window_bounds = array<i64: 36, 8>}, {pipeline_mode = #tpu.pipeline_mode<synchronous>, transform_indices = @transform_2, window_bounds = array<i64: 1, 8>}, {pipeline_mode = #tpu.pipeline_mode<synchronous>, transform_indices = @transform_3, window_bounds = array<i64: 1, 8>}, {transform_indices = @transform_4, window_bounds = array<i64: 1, 16, 128>}]} {
    %c0_i32 = arith.constant 0 : i32
    %0 = arith.cmpi eq, %arg1, %c0_i32 : i32
    %1 = arith.extui %0 : i1 to i32
    %c0_i32_0 = arith.constant 0 : i32
    %2 = arith.cmpi ne, %1, %c0_i32_0 : i32
    scf.if %2 {
      %cst_13 = arith.constant 0.000000e+00 : f32
      %31 = vector.broadcast %cst_13 : f32 to vector<1x24x4xf32>
      %c0_14 = arith.constant 0 : index
      %c0_15 = arith.constant 0 : index
      %c0_16 = arith.constant 0 : index
      %32 = vector.load %arg7[%c0_14, %c0_15, %c0_16] : memref<18x24x4xf32, #tpu.memory_space<vmem>>, vector<1x24x4xf32>
      tpu.vector_store %arg7[%c0_14, %c0_15, %c0_16], %31 {strides = array<i32>} : memref<18x24x4xf32, #tpu.memory_space<vmem>>, vector<1x24x4xf32>,
      %cst_17 = arith.constant 0.000000e+00 : f32
      %33 = vector.broadcast %cst_17 : f32 to vector<1x24x4xf32>
      %c17 = arith.constant 17 : index
      %c0_18 = arith.constant 0 : index
      %c0_19 = arith.constant 0 : index
      %34 = vector.load %arg7[%c17, %c0_18, %c0_19] : memref<18x24x4xf32, #tpu.memory_space<vmem>>, vector<1x24x4xf32>
      tpu.vector_store %arg7[%c17, %c0_18, %c0_19], %33 {strides = array<i32>} : memref<18x24x4xf32, #tpu.memory_space<vmem>>, vector<1x24x4xf32>,
      %cst_20 = arith.constant 0.000000e+00 : f32
      %35 = vector.broadcast %cst_20 : f32 to vector<18x8x4xf32>
      %c0_21 = arith.constant 0 : index
      %c16 = arith.constant 16 : index
      %c0_22 = arith.constant 0 : index
      %36 = vector.load %arg7[%c0_21, %c16, %c0_22] : memref<18x24x4xf32, #tpu.memory_space<vmem>>, vector<18x8x4xf32>
      tpu.vector_store %arg7[%c0_21, %c16, %c0_22], %35 {strides = array<i32>} : memref<18x24x4xf32, #tpu.memory_space<vmem>>, vector<18x8x4xf32>,
      %c0_23 = arith.constant 0 : index
      %c0_24 = arith.constant 0 : index
      %c0_25 = arith.constant 0 : index
      %c0_26 = arith.constant 0 : index
      %37 = vector.load %arg2[%c0_23, %c0_24, %c0_25, %c0_26] : memref<1x16x16x4xf32, #tpu.memory_space<vmem>>, vector<1x16x16x4xf32>
      %38 = vector.shape_cast %37 : vector<1x16x16x4xf32> to vector<16x16x4xf32>
      %c1 = arith.constant 1 : index
      %c0_27 = arith.constant 0 : index
      %c0_28 = arith.constant 0 : index
      %39 = vector.load %arg7[%c1, %c0_27, %c0_28] : memref<18x24x4xf32, #tpu.memory_space<vmem>>, vector<16x16x4xf32>
      tpu.vector_store %arg7[%c1, %c0_27, %c0_28], %38 {strides = array<i32>} : memref<18x24x4xf32, #tpu.memory_space<vmem>>, vector<16x16x4xf32>,
    } else {
    }
    %c16_i32 = arith.constant 16 : i32
    %3 = arith.muli %arg1, %c16_i32 : i32
    %4 = tpu.assume_multiple %3, 16 : i32
    %5 = arith.index_cast %4 : i32 to index
    %c0 = arith.constant 0 : index
    %c0_1 = arith.constant 0 : index
    %6 = vector.load %arg7[%5, %c0, %c0_1] : memref<18x24x4xf32, #tpu.memory_space<vmem>>, vector<18x24x4xf32>
    %7 = vector.shape_cast %6 : vector<18x24x4xf32> to vector<432x4xf32>
    %c1_i32 = arith.constant 1 : i32
    %8 = tpu.dynamic_rotate %7 by %c1_i32 dim 0 : vector<432x4xf32>, i32 -> vector<432x4xf32>
    %c431_i32 = arith.constant 431 : i32
    %9 = tpu.dynamic_rotate %7 by %c431_i32 dim 0 : vector<432x4xf32>, i32 -> vector<432x4xf32>
    %10 = tpu.concatenate %8, %7, %9 in 1 : vector<432x4xf32>, vector<432x4xf32>, vector<432x4xf32> -> vector<432x12xf32>
    %11 = vector.extract_strided_slice %10 {offsets = [0, 0], sizes = [384, 12], strides = [1, 1]} : vector<432x12xf32> to vector<384x12xf32>
    %12 = vector.extract_strided_slice %10 {offsets = [24, 0], sizes = [384, 12], strides = [1, 1]} : vector<432x12xf32> to vector<384x12xf32>
    %13 = vector.extract_strided_slice %10 {offsets = [48, 0], sizes = [384, 12], strides = [1, 1]} : vector<432x12xf32> to vector<384x12xf32>
    %14 = tpu.concatenate %11, %12, %13 in 1 : vector<384x12xf32>, vector<384x12xf32>, vector<384x12xf32> -> vector<384x36xf32>
    %c0_2 = arith.constant 0 : index
    %c0_3 = arith.constant 0 : index
    %15 = vector.load %arg3[%c0_2, %c0_3] : memref<36x8xf32, #tpu.memory_space<vmem>>, vector<36x8xf32>
    %cst = arith.constant dense<0.000000e+00> : vector<384x8xf32>
    %16 = tpu.matmul %14, %15, %cst {dimension_numbers = #tpu.dot_dimension_numbers<[1], [0], [0], [1], [0, 0, 1, 1], [], []>} : vector<384x36xf32>, vector<36x8xf32>, vector<384x8xf32> -> vector<384x8xf32>
    %c0_4 = arith.constant 0 : index
    %c0_5 = arith.constant 0 : index
    %17 = vector.load %arg4[%c0_4, %c0_5] : memref<1x8xf32, #tpu.memory_space<vmem>>, vector<1x8xf32>
    %18 = vector.broadcast %17 : vector<1x8xf32> to vector<384x8xf32>
    %19 = arith.mulf %16, %18 : vector<384x8xf32>
    %c0_6 = arith.constant 0 : index
    %c0_7 = arith.constant 0 : index
    %20 = vector.load %arg5[%c0_6, %c0_7] : memref<1x8xf32, #tpu.memory_space<vmem>>, vector<1x8xf32>
    %21 = vector.broadcast %20 : vector<1x8xf32> to vector<384x8xf32>
    %22 = arith.addf %19, %21 : vector<384x8xf32>
    %cst_8 = arith.constant 0.000000e+00 : f32
    %cst_9 = arith.constant 6.000000e+00 : f32
    %23 = vector.broadcast %cst_8 : f32 to vector<384x8xf32>
    %24 = arith.maximumf %23, %22 : vector<384x8xf32>
    %25 = vector.broadcast %cst_9 : f32 to vector<384x8xf32>
    %26 = arith.minimumf %25, %24 : vector<384x8xf32>
    %27 = vector.shape_cast %26 : vector<384x8xf32> to vector<16x24x8xf32>
    %28 = vector.extract_strided_slice %27 {offsets = [0, 0, 0], sizes = [16, 16, 8], strides = [1, 1, 1]} : vector<16x24x8xf32> to vector<16x16x8xf32>
    %29 = vector.shape_cast %28 : vector<16x16x8xf32> to vector<1x16x128xf32>
    %c0_10 = arith.constant 0 : index
    %c0_11 = arith.constant 0 : index
    %c0_12 = arith.constant 0 : index
    %30 = vector.load %arg6[%c0_10, %c0_11, %c0_12] : memref<1x16x128xf32, #tpu.memory_space<vmem>>, vector<1x16x128xf32>
    tpu.vector_store %arg6[%c0_10, %c0_11, %c0_12], %29 {strides = array<i32>} : memref<1x16x128xf32, #tpu.memory_space<vmem>>, vector<1x16x128xf32>,
    return
  }
  func.func @transform_0(%arg0: i32, %arg1: i32) -> (i32, i32, i32, i32) {
    %c0_i32 = arith.constant 0 : i32
    %c0_i32_0 = arith.constant 0 : i32
    %c0_i32_1 = arith.constant 0 : i32
    %c0_i32_2 = arith.constant 0 : i32
    return %arg0, %c0_i32, %c0_i32_0, %c0_i32_1 : i32, i32, i32, i32
  }
  func.func @transform_1(%arg0: i32, %arg1: i32) -> (i32, i32) {
    %c0_i32 = arith.constant 0 : i32
    %c0_i32_0 = arith.constant 0 : i32
    %c0_i32_1 = arith.constant 0 : i32
    return %c0_i32, %c0_i32_0 : i32, i32
  }
  func.func @transform_2(%arg0: i32, %arg1: i32) -> (i32, i32) {
    %c0_i32 = arith.constant 0 : i32
    %c0_i32_0 = arith.constant 0 : i32
    %c0_i32_1 = arith.constant 0 : i32
    return %c0_i32, %c0_i32_0 : i32, i32
  }
  func.func @transform_3(%arg0: i32, %arg1: i32) -> (i32, i32) {
    %c0_i32 = arith.constant 0 : i32
    %c0_i32_0 = arith.constant 0 : i32
    %c0_i32_1 = arith.constant 0 : i32
    return %c0_i32, %c0_i32_0 : i32, i32
  }
  func.func @transform_4(%arg0: i32, %arg1: i32) -> (i32, i32, i32) {
    %c0_i32 = arith.constant 0 : i32
    %c0_i32_0 = arith.constant 0 : i32
    return %arg0, %arg1, %c0_i32 : i32, i32, i32
  }
}

</mosaic_0001>

<bundles_post_ra>
// kernel: tpu_custom_call.1
= control target key start
LH: loop header
LB: loop body
LE: loop exit
PB: predicated region body
PF: predicated region fallthrough
CT: control target
= control target key end

     0   :  { %9 = vsyncpa [#allocation4], 0  ;;  %s5543_s0 = inlined_call_operand.vmem [shape: f32[2,16,16,4], index: 0, kind: input, shape index: {}]   ;;  %s5544_s1 = inlined_call_operand.vmem [shape: f32[36,8], index: 1, kind: input, shape index: {}]   ;;  %s5545_s2 = inlined_call_operand.vmem [shape: f32[1,8], index: 2, kind: input, shape index: {}]   ;;  %s5546_s3 = inlined_call_operand.vmem [shape: f32[1,8], index: 3, kind: input, shape index: {}]   ;;  %s5547_s4 = inlined_call_operand.hbm [shape: f32[2,16,128], index: 4, kind: output, shape index: {}]  }
   0x1   :  { %11 = vsyncpa [#allocation4 + $0x1], 0  ;;  %s3359_s15 = smov 0   ;;  %s3361_s16 = smov 0  }
   0x2   :  { %s3363_s17 = smov 0   ;;  %s3365_s18 = smov 0  }
   0x3   :  { %s3367_s19 = smov 0   ;;  %s3369_s20 = smov 0  }
   0x4 LB: > { %s2947_s21 = sadd.s32 4294967295, %s3310_s20   ;;  %s2948_s22 = sadd.s32 4294967294, %s3310_s20   ;;  %s3310_s20 = sphi %s3369_s20, %s17_s20   ;;  %s3306_s19 = sphi %s3367_s19, %s5803_s19   ;;  %s3302_s18 = sphi %s3365_s18, %s5802_s18   ;;  %s3298_s17 = sphi %s3363_s17, %s5801_s17   ;;  %s3294_s16 = sphi %s3361_s16, %s5800_s16   ;;  %s3290_s15 = sphi %s3359_s15, %s5799_s15  }
   0x5   : > { %s29_s23 = sadd.s32 1, %s3306_s19  ;;  %s127_s24 = sadd.s32 1, %s3298_s17 }
   0x6   : > { %p31_p0 = scmp.ge.s32.totalorder %s29_s23, 2  ;;  %p137_p1 = scmp.ne.s32.totalorder %s3298_s17, %s3294_s16 }
   0x7   : > { %p138_p2 = scmp.eq.s32.totalorder %s2947_s21, 1  ;;  %p143_p3 = scmp.ne.s32.totalorder %s3294_s16, %s3290_s15 }
   0x8   : > { %s5805_s23 = smov (%p31_p0, %s29_s23), 0  ;;  %p144_p5 = scmp.eq.s32.totalorder %s2948_s22, 1 }
   0x9   : > { %p3399_p4 = por %p138_p2, %p137_p1  ;;  %s122_s26 = ssub.s32 %s3306_s19, %s5805_s23 }
   0xa   : > { %p2951_p6 = scmp.ge.s32.totalorder %s3310_s20, 1  ;;  %p125_p7 = scmp.eq.s32.totalorder %s122_s26, 0 }
   0xb   : > { %p3406_p8 = por %p144_p5, %p143_p3  ;;  %p179_p9 = scmp.lt.s32.totalorder %s3310_s20, 3 }
   0xc   : > { %s3412_s28 = scalar_select %p125_p7, %s3298_s17, %s127_s24  }
   0xd   : > { %p180_p10 = pnand %p2951_p6, %p179_p9 }
   0xf   : > { %183 = sbr.rel (%p180_p10) target bundleno = 937 (0x3a9), region = 36 }
  0x14   : > { %vm215_vm0 = vcmask 31744   ;;  %p205_p11 = scmp.lt.s32.totalorder %s3302_s18, 1  ;;  %v3312_v0 = vmov 0.0   ;;  %v417_v1 = vlaneseq  ;;  %s3313_s8 = smov 4   ;;  %vm1712_vm3 = vcmask 1043456  }
  0x15   : > { %224 = vst.msk [vmem:[#allocation2 + $0x28] sm:$0xff] %vm215_vm0, %v3312_v0  ;;  %216 = vst.msk [vmem:[#allocation2] sm:$0xff] %vm215_vm0, %v3312_v0  ;;  %s3314_s9 = smov 8   ;;  %vm1070_vm4 = vcmask 64512   ;;  %s3316_s5 = smov 24   ;;  %vm1464_vm5 = vcmask 97280  }
  0x16   : > { %217 = vst.msk [vmem:[#allocation2 + $0x8] sm:$0xff] %vm215_vm0, %v3312_v0  ;;  %218 = vst.msk [vmem:[#allocation2 + $0x10] sm:$0xff] %vm215_vm0, %v3312_v0  ;;  %s206_s29 = scalar_select %p205_p11, %s3302_s18, 1  ;;  %v3471_v12 = vshrl.u32 %v417_v1, 7  ;;  %vm1513_vm6 = vcmask 195584   ;;  %vm1567_vm7 = vcmask 293888  }
  0x17   : > { %220 = vst.msk [vmem:[#allocation2 + $0x198] sm:$0xff] %vm215_vm0, %v3312_v0  ;;  %221 = vst.msk [vmem:[#allocation2 + $0x1a0] sm:$0xff] %vm215_vm0, %v3312_v0  ;;  %s3319_s11 = smov 16   ;;  %s3320_s12 = smov 32   ;;  %vm2813_vm8 = vcmask 130048   ;;  %vm2818_vm9 = vcmask 261120  }
  0x18   : > { %222 = vst.msk [vmem:[#allocation2 + $0x1a8] sm:$0xff] %vm215_vm0, %v3312_v0  ;;  %225 = vst.msk [vmem:[#allocation2 + $0x40] sm:$0xff] %vm215_vm0, %v3312_v0  ;;  %s3011_s30 = sshll.u32 %s206_s29, 8  ;;  %vm419_vm1 = vcmp.lt.s32.totalorder %v3471_v12, 1  ;;  %vm528_vm2 = vcmp.lt.s32.totalorder %v3471_v12, 7  ;;  %s3321_s13 = smov 40  }
  0x19   : > { %226 = vst.msk [vmem:[#allocation2 + $0x58] sm:$0xff] %vm215_vm0, %v3312_v0  ;;  %227 = vst.msk [vmem:[#allocation2 + $0x70] sm:$0xff] %vm215_vm0, %v3312_v0  ;;  %s3445_s7 = scalar_lea.vmem %s5543_s0, %s3011_s30  ;;  %s3315_s30 = smov 12   ;;  %vm2821_vm10 = vcmask 326656   ;;  %vm2824_vm11 = vcmask 392192   ;;  %vm2827_vm12 = vcmask 457728  }
  0x1a   : > { %228 = vst.msk [vmem:[#allocation2 + $0x88] sm:$0xff] %vm215_vm0, %v3312_v0  ;;  %229 = vst.msk [vmem:[#allocation2 + $0xa0] sm:$0xff] %vm215_vm0, %v3312_v0  ;;  %v242_v2 = vld [vmem:[%s3445_s7 + $0x8] sm:$0xff]  ;;  %v241_v3 = vld [vmem:[%s3445_s7] sm:$0xff]  ;;  %s3322_s14 = smov 48   ;;  %s3323_s21 = smov 56  }
  0x1b   : > { %230 = vst.msk [vmem:[#allocation2 + $0xb8] sm:$0xff] %vm215_vm0, %v3312_v0  ;;  %231 = vst.msk [vmem:[#allocation2 + $0xd0] sm:$0xff] %vm215_vm0, %v3312_v0  ;;  %v243_v4 = vld [vmem:[%s3445_s7 + $0x10] sm:$0xff]  ;;  %v244_v5 = vld [vmem:[%s3445_s7 + $0x18] sm:$0xff]  ;;  %s3324_s22 = smov 64   ;;  %s3325_s24 = smov 72  }
  0x1c   : > { %232 = vst.msk [vmem:[#allocation2 + $0xe8] sm:$0xff] %vm215_vm0, %v3312_v0  ;;  %233 = vst.msk [vmem:[#allocation2 + $0x100] sm:$0xff] %vm215_vm0, %v3312_v0  ;;  %v245_v6 = vld [vmem:[%s3445_s7 + $0x20] sm:$0xff]  ;;  %v246_v7 = vld [vmem:[%s3445_s7 + $0x28] sm:$0xff]  ;;  %s3326_s26 = smov 80   ;;  %s3327_s29 = smov 88  }
  0x1d   : > { %234 = vst.msk [vmem:[#allocation2 + $0x118] sm:$0xff] %vm215_vm0, %v3312_v0  ;;  %235 = vst.msk [vmem:[#allocation2 + $0x130] sm:$0xff] %vm215_vm0, %v3312_v0  ;;  %v3456_v8 = vld [vmem:[#allocation2 + $0x28] sm:$0xff]  ;;  %v3458_v9 = vld [vmem:[#allocation2] sm:$0xff]  ;;  %s3330_s6 = smov 112   ;;  %vm2830_vm13 = vcmask 523264  }
  0x1e   : > { %236 = vst.msk [vmem:[#allocation2 + $0x148] sm:$0xff] %vm215_vm0, %v3312_v0  ;;  %237 = vst.msk [vmem:[#allocation2 + $0x160] sm:$0xff] %vm215_vm0, %v3312_v0  ;;  %647 = vrot.lane.b32.xlu1 %v3456_v8, %s3313_s8  ;;  %637 = vrot.lane.b32.xlu0 %v3458_v9, %s3313_s8  ;;  %v3469_v11 = vld [vmem:[#allocation2 + $0x8] sm:$0xff]  ;;  %v5548_v13 = vrot.slane %v3458_v9, 7  ;;  %v257_v16 = vld [vmem:[%s3445_s7 + $0x80] sm:$0xff]  ;;  %v368_v38 = vrot.slane %v3456_v8, 7 }
  0x1f   : > { %238 = vst.msk [vmem:[#allocation2 + $0x178] sm:$0xff] %vm215_vm0, %v3312_v0  ;;  %239 = vst.msk [vmem:[#allocation2 + $0x190] sm:$0xff] %vm215_vm0, %v3312_v0  ;;  %v364_v15 = vrot.slane %v3469_v11, 7  ;;  %v258_v17 = vld [vmem:[%s3445_s7 + $0x88] sm:$0xff]  ;;  %v259_v18 = vld [vmem:[%s3445_s7 + $0x90] sm:$0xff]  ;;  %vm2833_vm14 = vcmask 588800  }
  0x20   : > { %223 = vst.msk [vmem:[#allocation2 + $0x10] sm:$0xff] %vm215_vm0, %v3312_v0  ;;  %240 = vst.msk [vmem:[#allocation2 + $0x1a8] sm:$0xff] %vm215_vm0, %v3312_v0  ;;  %v260_v19 = vld [vmem:[%s3445_s7 + $0x98] sm:$0xff]  ;;  %v261_v20 = vld [vmem:[%s3445_s7 + $0xa0] sm:$0xff]  ;;  %vm2836_vm15 = vcmask 654336  }
  0x21   : > { %275 = vst.msk [vmem:[#allocation2 + $0x20] sm:$0xff] %vm215_vm0, %v242_v2  ;;  %274 = vst.msk [vmem:[#allocation2 + $0x18] sm:$0xff] %vm215_vm0, %v241_v3  ;;  %v262_v21 = vld [vmem:[%s3445_s7 + $0xa8] sm:$0xff]  ;;  %v3497_v23 = vsel %vm419_vm1, %v5548_v13, %v364_v15  ;;  %v247_v24 = vld [vmem:[%s3445_s7 + $0x30] sm:$0xff] }
  0x22   : > { %276 = vst.msk [vmem:[#allocation2 + $0x30] sm:$0xff] %vm215_vm0, %v243_v4  ;;  %277 = vst.msk [vmem:[#allocation2 + $0x38] sm:$0xff] %vm215_vm0, %v244_v5  ;;  %639 = vrot.lane.b32.xlu0 %v3469_v11, %s3313_s8  ;;  %v263_v27 = vld [vmem:[%s3445_s7 + $0xb0] sm:$0xff]  ;;  %v248_v28 = vld [vmem:[%s3445_s7 + $0x38] sm:$0xff]  ;;  %v479_v4 = vrot.slane %v3456_v8, 1 }
  0x23   : > { %278 = vst.msk [vmem:[#allocation2 + $0x48] sm:$0xff] %vm215_vm0, %v245_v6  ;;  %279 = vst.msk [vmem:[#allocation2 + $0x50] sm:$0xff] %vm215_vm0, %v246_v7  ;;  %v264_v29 = vld [vmem:[%s3445_s7 + $0xb8] sm:$0xff]  ;;  %v3529_v32 = vld [vmem:[#allocation2 + $0x40] sm:$0xff] }
  0x24   : > { %290 = vst.msk [vmem:[#allocation2 + $0xd8] sm:$0xff] %vm215_vm0, %v257_v16  ;;  %291 = vst.msk [vmem:[#allocation2 + $0xe0] sm:$0xff] %vm215_vm0, %v258_v17  ;;  %v249_v34 = vld [vmem:[%s3445_s7 + $0x40] sm:$0xff]  ;;  %v250_v36 = vld [vmem:[%s3445_s7 + $0x48] sm:$0xff]  ;;  %v371_v61 = vrot.slane %v3529_v32, 7 }
  0x25   : > { %292 = vst.msk [vmem:[#allocation2 + $0xf0] sm:$0xff] %vm215_vm0, %v259_v18  ;;  %293 = vst.msk [vmem:[#allocation2 + $0xf8] sm:$0xff] %vm215_vm0, %v260_v19  ;;  %v265_v35 = vld [vmem:[%s3445_s7 + $0xc0] sm:$0xff]  ;;  %v266_v37 = vld [vmem:[%s3445_s7 + $0xc8] sm:$0xff] }
  0x26   : > { %5622 = vst [vmem:[#allocation7_spill] sm:$0xff] %v3497_v23  ;;  %294 = vst.msk [vmem:[#allocation2 + $0x108] sm:$0xff] %vm215_vm0, %v261_v20  ;;  %v251_v40 = vld [vmem:[%s3445_s7 + $0x50] sm:$0xff]  ;;  %v252_v42 = vld [vmem:[%s3445_s7 + $0x58] sm:$0xff] }
  0x27   : > { %v3467_v10 = vld [vmem:[#allocation2 + $0x10] sm:$0xff]  ;;  %295 = vst.msk [vmem:[#allocation2 + $0x110] sm:$0xff] %vm215_vm0, %v262_v21  ;;  %280 = vst.msk [vmem:[#allocation2 + $0x60] sm:$0xff] %vm215_vm0, %v247_v24  ;;  %v268_v46 = vld [vmem:[%s3445_s7 + $0xd8] sm:$0xff] }
  0x28   : > { %v365_v14 = vrot.slane %v3467_v10, 7  ;;  %641 = vrot.lane.b32.xlu1 %v3467_v10, %s3313_s8  ;;  %v3506_v25 = vld [vmem:[#allocation2 + $0x20] sm:$0xff]  ;;  %v3508_v26 = vld [vmem:[#allocation2 + $0x18] sm:$0xff]  ;;  %296 = vst.msk [vmem:[#allocation2 + $0x120] sm:$0xff] %vm215_vm0, %v263_v27  ;;  %281 = vst.msk [vmem:[#allocation2 + $0x68] sm:$0xff] %vm215_vm0, %v248_v28 }
  0x29   : > { %645 = vrot.lane.b32.xlu0 %v3506_v25, %s3313_s8  ;;  %v3519_v30 = vld [vmem:[#allocation2 + $0x30] sm:$0xff]  ;;  %v3521_v31 = vld [vmem:[#allocation2 + $0x38] sm:$0xff]  ;;  %297 = vst.msk [vmem:[#allocation2 + $0x128] sm:$0xff] %vm215_vm0, %v264_v29  ;;  %282 = vst.msk [vmem:[#allocation2 + $0x78] sm:$0xff] %vm215_vm0, %v249_v34  ;;  %v367_v39 = vrot.slane %v3506_v25, 7  ;;  %v366_v43 = vrot.slane %v3508_v26, 7 }
  0x2a   : > { %v3491_v22 = vsel %vm419_vm1, %v364_v15, %v365_v14  ;;  %v3531_v33 = vld [vmem:[#allocation2 + $0x48] sm:$0xff]  ;;  %298 = vst.msk [vmem:[#allocation2 + $0x138] sm:$0xff] %vm215_vm0, %v265_v35  ;;  %283 = vst.msk [vmem:[#allocation2 + $0x80] sm:$0xff] %vm215_vm0, %v250_v36  ;;  %v267_v41 = vld [vmem:[%s3445_s7 + $0xd0] sm:$0xff]  ;;  %v369_v50 = vrot.slane %v3519_v30, 7  ;;  %v370_v51 = vrot.slane %v3521_v31, 7 }
  0x2b   : > { %5621 = vst [vmem:[#allocation6_spill] sm:$0xff] %v3491_v22  ;;  %299 = vst.msk [vmem:[#allocation2 + $0x140] sm:$0xff] %vm215_vm0, %v266_v37  ;;  %v3553_v44 = vld [vmem:[#allocation2 + $0x50] sm:$0xff]  ;;  %v3555_v45 = vld [vmem:[#allocation2 + $0xd8] sm:$0xff]  ;;  %v3568_v52 = vsel %vm419_vm1, %v367_v39, %v368_v38  ;;  %v478_v55 = vrot.slane %v3506_v25, 1  ;;  %v5552_v56 = vrot.slane %v3508_v26, 1  ;;  %v3588_v60 = vsel %vm419_vm1, %v366_v43, %v367_v39 }
  0x2c   : > { %643 = vrot.lane.b32.xlu1 %v3508_v26, %s3313_s8  ;;  %284 = vst.msk [vmem:[#allocation2 + $0x90] sm:$0xff] %vm215_vm0, %v251_v40  ;;  %300 = vst.msk [vmem:[#allocation2 + $0x150] sm:$0xff] %vm215_vm0, %v267_v41  ;;  %v3559_v47 = vld [vmem:[#allocation2 + $0xe0] sm:$0xff]  ;;  %v254_v53 = vld [vmem:[%s3445_s7 + $0x68] sm:$0xff]  ;;  %v5555_v57 = vrot.slane %v3555_v45, 1  ;;  %v372_v62 = vrot.slane %v3531_v33, 7  ;;  %v3598_v0 = vsel %vm419_vm1, %v365_v14, %v366_v43  ;;  %v3602_v1 = vsel %vm419_vm1, %v368_v38, %v369_v50 }
  0x2d   : > { %649 = vrot.lane.b32.xlu0 %v3519_v30, %s3313_s8  ;;  %285 = vst.msk [vmem:[#allocation2 + $0x98] sm:$0xff] %vm215_vm0, %v252_v42  ;;  %301 = vst.msk [vmem:[#allocation2 + $0x158] sm:$0xff] %vm215_vm0, %v268_v46  ;;  %v253_v48 = vld [vmem:[%s3445_s7 + $0x60] sm:$0xff]  ;;  %v270_v54 = vld [vmem:[%s3445_s7 + $0xe8] sm:$0xff]  ;;  %v502_v58 = vrot.slane %v3559_v47, 1  ;;  %v373_v63 = vrot.slane %v3553_v44, 7  ;;  %v3606_v2 = vsel %vm419_vm1, %v369_v50, %v370_v51  ;;  %v578_v6 = vsel %vm528_vm2, %v5552_v56, %v478_v55 }
  0x2e   : > { %v269_v49 = vld [vmem:[%s3445_s7 + $0xe0] sm:$0xff]  ;;  %286 = vst.msk [vmem:[#allocation2 + $0xa8] sm:$0xff] %vm215_vm0, %v253_v48  ;;  %287 = vst.msk [vmem:[#allocation2 + $0xb0] sm:$0xff] %vm215_vm0, %v254_v53  ;;  %v3584_v59 = vld [vmem:[#allocation2 + $0xf0] sm:$0xff]  ;;  %v391_v3 = vrot.slane %v3559_v47, 7  ;;  %v5553_v7 = vrot.slane %v3555_v45, 7  ;;  %v3625_v16 = vsel %vm419_vm1, %v370_v51, %v371_v61  ;;  %v3629_v8 = vsel %vm419_vm1, %v371_v61, %v372_v62 }
  0x2f   : > { %302 = vst.msk [vmem:[#allocation2 + $0x168] sm:$0xff] %vm215_vm0, %v269_v49  ;;  %303 = vst.msk [vmem:[#allocation2 + $0x170] sm:$0xff] %vm215_vm0, %v270_v54  ;;  %v554_v5 = vsel %vm528_vm2, %v5555_v57, %v502_v58  ;;  %v340_v14 = vld [vmem:[#allocation2 + $0xf8] sm:$0xff]  ;;  %v338_v15 = vld [vmem:[#allocation2 + $0xe8] sm:$0xff]  ;;  %v393_v17 = vrot.slane %v3584_v59, 7  ;;  %v3636_v19 = vsel %vm419_vm1, %v372_v62, %v373_v63  ;;  %v480_v20 = vrot.slane %v3519_v30, 1 }
  0x30   : > { %651 = vrot.lane.b32.xlu1 %v3521_v31, %s3313_s8  ;;  %v394_v18 = vrot.slane %v340_v14, 7  ;;  %v481_v21 = vrot.slane %v3521_v31, 1  ;;  %v3646_v24 = vsel %vm419_vm1, %v5553_v7, %v391_v3  ;;  %v255_v25 = vld [vmem:[%s3445_s7 + $0x70] sm:$0xff]  ;;  %v577_v27 = vsel %vm528_vm2, %v478_v55, %v479_v4  ;;  %v342_v30 = vld [vmem:[#allocation2 + $0x108] sm:$0xff]  ;;  %v341_v38 = vld [vmem:[#allocation2 + $0x100] sm:$0xff] }
  0x31   : > { %653 = vrot.lane.b32.xlu0 %v3529_v32, %s3313_s8  ;;  %v503_v28 = vrot.slane %v338_v15, 1  ;;  %v392_v29 = vrot.slane %v338_v15, 7  ;;  %288 = vst.msk [vmem:[#allocation2 + $0xc0] sm:$0xff] %vm215_vm0, %v255_v25  ;;  %v482_v35 = vrot.slane %v3529_v32, 1  ;;  %v504_v36 = vrot.slane %v3584_v59, 1  ;;  %v271_v40 = vld [vmem:[%s3445_s7 + $0xf0] sm:$0xff] }
  0x32   : > { %v3658_v34 = vsel %vm419_vm1, %v393_v17, %v394_v18  ;;  %v575_v37 = vsel %vm528_vm2, %v480_v20, %v481_v21  ;;  %v396_v39 = vrot.slane %v342_v30, 7  ;;  %v505_v41 = vrot.slane %v340_v14, 1  ;;  %304 = vst.msk [vmem:[#allocation2 + $0x180] sm:$0xff] %vm215_vm0, %v271_v40  ;;  %v256_v51 = vld [vmem:[%s3445_s7 + $0x78] sm:$0xff]  ;;  %v343_v61 = vld [vmem:[#allocation2 + $0x110] sm:$0xff]  ;;  %v3917_v7 = vld [vmem:[#allocation2 + $0x160] sm:$0xff] }
  0x33   : > { %v3654_v31 = vsel %vm419_vm1, %v392_v29, %v393_v17  ;;  %v553_v42 = vsel %vm528_vm2, %v502_v58, %v503_v28  ;;  %v3671_v32 = vsel %vm419_vm1, %v391_v3, %v392_v29  ;;  %v395_v43 = vrot.slane %v341_v38, 7  ;;  %289 = vst.msk [vmem:[#allocation2 + $0xc8] sm:$0xff] %vm215_vm0, %v256_v51  ;;  %v320_v54 = vld [vmem:[#allocation2 + $0x58] sm:$0xff]  ;;  %5648 = vst [vmem:[#allocation33_spill] sm:$0xff] %v3917_v7 }
  0x34   : > { %655 = vrot.lane.b32.xlu1 %v3531_v33, %s3313_s8  ;;  %v574_v48 = vsel %vm528_vm2, %v481_v21, %v482_v35  ;;  %v551_v49 = vsel %vm528_vm2, %v504_v36, %v505_v41  ;;  %v506_v50 = vrot.slane %v341_v38, 1  ;;  %v272_v55 = vld [vmem:[%s3445_s7 + $0xf8] sm:$0xff]  ;;  %v374_v58 = vrot.slane %v320_v54, 7  ;;  %s3331_s7 = smov 120  }
  0x35   : > { %657 = vrot.lane.b32.xlu0 %v3553_v44, %s3313_s8  ;;  %v3676_v46 = vsel %vm419_vm1, %v394_v18, %v395_v43  ;;  %305 = vst.msk [vmem:[#allocation2 + $0x188] sm:$0xff] %vm215_vm0, %v272_v55  ;;  %v397_v3 = vrot.slane %v343_v61, 7  ;;  %v518_v57 = vrot.slane %v3917_v7, 1 }
  0x36   : > { %v550_v53 = vsel %vm528_vm2, %v505_v41, %v506_v50  ;;  %v3706_v62 = vsel %vm419_vm1, %v373_v63, %v374_v58  ;;  %v484_v63 = vrot.slane %v3553_v44, 1 }
  0x37   : > { %5623 = vst [vmem:[#allocation8_spill] sm:$0xff] %v3706_v62  ;;  %v3713_v17 = vsel %vm419_vm1, %v396_v39, %v397_v3  ;;  %v4061_v62 = vld [vmem:[#allocation2 + $0x190] sm:$0xff] }
  0x38   : > { %691 = vrot.lane.b32.xlu1 %v3555_v45, %s3313_s8  ;;  %5624 = vst [vmem:[#allocation9_spill] sm:$0xff] %v3713_v17  ;;  %5661 = vst [vmem:[#allocation46_spill] sm:$0xff] %v4061_v62 }
  0x39   : > { %693 = vrot.lane.b32.xlu0 %v3559_v47, %s3313_s8  ;;  %v3682_v47 = vsel %vm419_vm1, %v395_v43, %v396_v39 }
  0x3c   : > { %697 = vrot.lane.b32.xlu1 %v3584_v59, %s3313_s8  ;;  %v576_v59 = vsel %vm528_vm2, %v479_v4, %v480_v20  ;;  %v508_v20 = vrot.slane %v343_v61, 1 }
  0x3d   : > { %859 = vrot.lane.b32.xlu0 %v578_v6, %s3314_s9  ;;  %v507_v6 = vrot.slane %v342_v30, 1 }
  0x3f   : > { %v549_v18 = vsel %vm528_vm2, %v506_v50, %v507_v6  ;;  %v548_v25 = vsel %vm528_vm2, %v507_v6, %v508_v20 }
  0x40   : > { %907 = vrot.lane.b32.xlu1 %v554_v5, %s3314_s9  ;;  %v483_v5 = vrot.slane %v3531_v33, 1 }
  0x41   : > { %699 = vrot.lane.b32.xlu0 %v340_v14, %s3313_s8  ;;  %v552_v14 = vsel %vm528_vm2, %v503_v28, %v504_v36  ;;  %v3732_v28 = vld [vmem:[#allocation2 + $0x68] sm:$0xff] }
  0x42   : > { %v573_v33 = vsel %vm528_vm2, %v482_v35, %v483_v5  ;;  %v572_v44 = vsel %vm528_vm2, %v483_v5, %v484_v63  ;;  %5626 = vst [vmem:[#allocation11_spill] sm:$0xff] %v3732_v28  ;;  %v5549_v29 = vrot.slane %v3732_v28, 7  ;;  %v485_v35 = vrot.slane %v320_v54, 1 }
  0x43   : > { %v487_v55 = vrot.slane %v3732_v28, 1 }
  0x44   : > { %861 = vrot.lane.b32.xlu1 %v577_v27, %s3314_s9  ;;  %v321_v27 = vld [vmem:[#allocation2 + $0x60] sm:$0xff]  ;;  %v571_v40 = vsel %vm528_vm2, %v484_v63, %v485_v35 }
  0x45   : > { %865 = vrot.lane.b32.xlu0 %v575_v37, %s3314_s9  ;;  %v3741_v37 = vld [vmem:[#allocation2 + $0x120] sm:$0xff] }
  0x46   : > { %5628 = vst [vmem:[#allocation13_spill] sm:$0xff] %v3741_v37  ;;  %v5550_v39 = vrot.slane %v3741_v37, 7  ;;  %v510_v50 = vrot.slane %v3741_v37, 1 }
  0x48   : > { %909 = vrot.lane.b32.xlu1 %v553_v42, %s3314_s9  ;;  %v486_v42 = vrot.slane %v321_v27, 1 }
  0x49   : > { %913 = vrot.lane.b32.xlu0 %v551_v49, %s3314_s9 }
  0x4c   : > { %867 = vrot.lane.b32.xlu1 %v574_v48, %s3314_s9  ;;  %v570_v48 = vsel %vm528_vm2, %v485_v35, %v486_v42 }
  0x4d   : > { %915 = vrot.lane.b32.xlu0 %v550_v53, %s3314_s9  ;;  %v5554_v53 = vrot.slane %v3458_v9, 1 }
  0x50   : > { %695 = vrot.lane.b32.xlu1 %v338_v15, %s3313_s8  ;;  %v344_v15 = vld [vmem:[#allocation2 + $0x118] sm:$0xff] }
  0x51   : > { %701 = vrot.lane.b32.xlu0 %v341_v38, %s3313_s8  ;;  %v398_v4 = vrot.slane %v344_v15, 7  ;;  %v509_v41 = vrot.slane %v344_v15, 1 }
  0x53   : > { %v3724_v21 = vsel %vm419_vm1, %v397_v3, %v398_v4  ;;  %v3758_v43 = vsel %vm419_vm1, %v398_v4, %v5550_v39  ;;  %v547_v49 = vsel %vm528_vm2, %v508_v20, %v509_v41  ;;  %v546_v51 = vsel %vm528_vm2, %v509_v41, %v510_v50  ;;  %v3815_v20 = vld [vmem:[#allocation2 + $0x78] sm:$0xff]  ;;  %v3833_v41 = vld [vmem:[#allocation2 + $0x140] sm:$0xff] }
  0x54   : > { %863 = vrot.lane.b32.xlu1 %v576_v59, %s3314_s9  ;;  %5625 = vst [vmem:[#allocation10_spill] sm:$0xff] %v3724_v21  ;;  %5630 = vst [vmem:[#allocation15_spill] sm:$0xff] %v3758_v43  ;;  %v3778_v59 = vld [vmem:[#allocation2 + $0x70] sm:$0xff] }
  0x55   : > { %911 = vrot.lane.b32.xlu0 %v552_v14, %s3314_s9  ;;  %5632 = vst [vmem:[#allocation17_spill] sm:$0xff] %v3778_v59  ;;  %v488_v6 = vrot.slane %v3778_v59, 1  ;;  %v3795_v14 = vld [vmem:[#allocation2 + $0x130] sm:$0xff]  ;;  %5634 = vst [vmem:[#allocation19_spill] sm:$0xff] %v3815_v20 }
  0x56   : > { %5633 = vst [vmem:[#allocation18_spill] sm:$0xff] %v3795_v14  ;;  %5637 = vst [vmem:[#allocation22_spill] sm:$0xff] %v3833_v41 }
  0x57   : > { %v568_v4 = vsel %vm528_vm2, %v487_v55, %v488_v6 }
  0x58   : > { %703 = vrot.lane.b32.xlu1 %v342_v30, %s3313_s8  ;;  %v375_v30 = vrot.slane %v321_v27, 7 }
  0x59   : > { %869 = vrot.lane.b32.xlu0 %v573_v33, %s3314_s9 }
  0x5a   : > { %v3739_v36 = vsel %vm419_vm1, %v374_v58, %v375_v30  ;;  %v3749_v38 = vsel %vm419_vm1, %v375_v30, %v5549_v29  ;;  %v3776_v58 = vld [vmem:[#allocation2 + $0x128] sm:$0xff] }
  0x5b   : > { %5627 = vst [vmem:[#allocation12_spill] sm:$0xff] %v3739_v36  ;;  %5629 = vst [vmem:[#allocation14_spill] sm:$0xff] %v3749_v38  ;;  %v511_v5 = vrot.slane %v3776_v58, 1 }
  0x5c   : > { %917 = vrot.lane.b32.xlu1 %v549_v18, %s3314_s9  ;;  %5631 = vst [vmem:[#allocation16_spill] sm:$0xff] %v3776_v58  ;;  %v512_v18 = vrot.slane %v3795_v14, 1 }
  0x5d   : > { %871 = vrot.lane.b32.xlu0 %v572_v44, %s3314_s9  ;;  %v545_v63 = vsel %vm528_vm2, %v510_v50, %v511_v5  ;;  %v3821_v44 = vld [vmem:[#allocation2 + $0x138] sm:$0xff] }
  0x5e   : > { %v544_v33 = vsel %vm528_vm2, %v511_v5, %v512_v18  ;;  %5635 = vst [vmem:[#allocation20_spill] sm:$0xff] %v3821_v44  ;;  %v513_v35 = vrot.slane %v3821_v44, 1 }
  0x60   : > { %919 = vrot.lane.b32.xlu1 %v548_v25, %s3314_s9  ;;  %v489_v25 = vrot.slane %v3815_v20, 1 }
  0x61   : > { %705 = vrot.lane.b32.xlu0 %v343_v61, %s3313_s8  ;;  %v5551_v61 = vrot.slane %v3467_v10, 1 }
  0x62   : > { %v567_v30 = vsel %vm528_vm2, %v488_v6, %v489_v25 }
  0x64   : > { %659 = vrot.lane.b32.xlu1 %v320_v54, %s3313_s8  ;;  %v475_v54 = vrot.slane %v3469_v11, 1  ;;  %v569_v11 = vsel %vm528_vm2, %v486_v42, %v487_v55  ;;  %v3853_v55 = vld [vmem:[#allocation2 + $0x148] sm:$0xff] }
  0x65   : > { %707 = vrot.lane.b32.xlu0 %v344_v15, %s3313_s8  ;;  %5639 = vst [vmem:[#allocation24_spill] sm:$0xff] %v3853_v55  ;;  %v515_v6 = vrot.slane %v3853_v55, 1 }
  0x66   : > { %v3785_v3 = vsel %vm528_vm2, %v5554_v53, %v475_v54  ;;  %v3801_v15 = vsel %vm528_vm2, %v475_v54, %v5551_v61 }
  0x68   : > { %873 = vrot.lane.b32.xlu1 %v571_v40, %s3314_s9 }
  0x69   : > { %921 = vrot.lane.b32.xlu0 %v547_v49, %s3314_s9  ;;  %v514_v49 = vrot.slane %v3833_v41, 1 }
  0x6b   : > { %v542_v50 = vsel %vm528_vm2, %v513_v35, %v514_v49 }
  0x6c   : > { %875 = vrot.lane.b32.xlu1 %v570_v48, %s3314_s9  ;;  %v543_v48 = vsel %vm528_vm2, %v512_v18, %v513_v35 }
  0x6d   : > { %923 = vrot.lane.b32.xlu0 %v546_v51, %s3314_s9  ;;  %v3847_v51 = vld [vmem:[#allocation2 + $0x88] sm:$0xff] }
  0x6e   : > { %5638 = vst [vmem:[#allocation23_spill] sm:$0xff] %v3847_v51  ;;  %v491_v54 = vrot.slane %v3847_v51, 1 }
  0x70   : > { %661 = vrot.lane.b32.xlu1 %v321_v27, %s3313_s8  ;;  %v3823_v27 = vld [vmem:[#allocation2 + $0x80] sm:$0xff] }
  0x71   : > { %709 = vrot.lane.b32.xlu0 %v3741_v37, %s3313_s8  ;;  %5636 = vst [vmem:[#allocation21_spill] sm:$0xff] %v3823_v27  ;;  %v490_v40 = vrot.slane %v3823_v27, 1 }
  0x73   : > { %v566_v42 = vsel %vm528_vm2, %v489_v25, %v490_v40  ;;  %v565_v5 = vsel %vm528_vm2, %v490_v40, %v491_v54 }
  0x74   : > { %663 = vrot.lane.b32.xlu1 %v3732_v28, %s3313_s8 }
  0x75   : > { %711 = vrot.lane.b32.xlu0 %v3776_v58, %s3313_s8 }
  0x78   : > { %877 = vrot.lane.b32.xlu1 %v569_v11, %s3314_s9  ;;  %v3855_v11 = vld [vmem:[#allocation2 + $0x90] sm:$0xff] }
  0x79   : > { %925 = vrot.lane.b32.xlu0 %v545_v63, %s3314_s9  ;;  %5640 = vst [vmem:[#allocation25_spill] sm:$0xff] %v3855_v11 }
  0x7c   : > { %879 = vrot.lane.b32.xlu1 %v568_v4, %s3314_s9  ;;  %v492_v4 = vrot.slane %v3855_v11, 1 }
  0x7d   : > { %927 = vrot.lane.b32.xlu0 %v544_v33, %s3314_s9  ;;  %v3869_v33 = vld [vmem:[#allocation2 + $0x150] sm:$0xff] }
  0x7e   : > { %5642 = vst [vmem:[#allocation27_spill] sm:$0xff] %v3869_v33  ;;  %v564_v25 = vsel %vm528_vm2, %v491_v54, %v492_v4  ;;  %v516_v35 = vrot.slane %v3869_v33, 1  ;;  %v3891_v54 = vld [vmem:[#allocation2 + $0x98] sm:$0xff] }
  0x7f   : > { %5645 = vst [vmem:[#allocation30_spill] sm:$0xff] %v3891_v54 }
  0x80   : > { %665 = vrot.lane.b32.xlu1 %v3778_v59, %s3313_s8 }
  0x81   : > { %713 = vrot.lane.b32.xlu0 %v3795_v14, %s3313_s8  ;;  %v4013_v14 = vld [vmem:[#allocation2 + $0x180] sm:$0xff] }
  0x82   : > { %5656 = vst [vmem:[#allocation41_spill] sm:$0xff] %v4013_v14 }
  0x84   : > { %667 = vrot.lane.b32.xlu1 %v3815_v20, %s3313_s8 }
  0x85   : > { %715 = vrot.lane.b32.xlu0 %v3821_v44, %s3313_s8 }
  0x88   : > { %881 = vrot.lane.b32.xlu1 %v567_v30, %s3314_s9  ;;  %v541_v30 = vsel %vm528_vm2, %v514_v49, %v515_v6  ;;  %v493_v49 = vrot.slane %v3891_v54, 1 }
  0x89   : > { %929 = vrot.lane.b32.xlu0 %v543_v48, %s3314_s9  ;;  %v540_v48 = vsel %vm528_vm2, %v515_v6, %v516_v35  ;;  %v3903_v6 = vld [vmem:[#allocation2 + $0xa0] sm:$0xff] }
  0x8a   : > { %5647 = vst [vmem:[#allocation32_spill] sm:$0xff] %v3903_v6  ;;  %v563_v29 = vsel %vm528_vm2, %v492_v4, %v493_v49  ;;  %v494_v39 = vrot.slane %v3903_v6, 1 }
  0x8c   : > { %883 = vrot.lane.b32.xlu1 %v566_v42, %s3314_s9  ;;  %v562_v53 = vsel %vm528_vm2, %v493_v49, %v494_v39  ;;  %v3939_v49 = vld [vmem:[#allocation2 + $0xa8] sm:$0xff] }
  0x8d   : > { %931 = vrot.lane.b32.xlu0 %v542_v50, %s3314_s9  ;;  %5649 = vst [vmem:[#allocation34_spill] sm:$0xff] %v3939_v49 }
  0x90   : > { %669 = vrot.lane.b32.xlu1 %v3823_v27, %s3313_s8  ;;  %v3865_v63 = vpop.permute.xlu1 %647  ;;  %v3867_v18 = vpop.permute.xlu0 %637 }
  0x91   : > { %717 = vrot.lane.b32.xlu0 %v3833_v41, %s3313_s8  ;;  %5641 = vst [vmem:[#allocation26_spill] sm:$0xff] %v3867_v18 }
  0x94   : > { %671 = vrot.lane.b32.xlu1 %v3847_v51, %s3313_s8  ;;  %v3881_v42 = vpop.permute.xlu0 %639 }
  0x95   : > { %719 = vrot.lane.b32.xlu0 %v3853_v55, %s3313_s8  ;;  %5644 = vst [vmem:[#allocation29_spill] sm:$0xff] %v3881_v42 }
  0x98   : > { %885 = vrot.lane.b32.xlu1 %v565_v5, %s3314_s9 }
  0x99   : > { %933 = vrot.lane.b32.xlu0 %v541_v30, %s3314_s9  ;;  %v3901_v30 = vld [vmem:[#allocation2 + $0x158] sm:$0xff] }
  0x9a   : > { %v3879_v40 = vpop.permute.xlu1 %641  ;;  %5646 = vst [vmem:[#allocation31_spill] sm:$0xff] %v3901_v30 }
  0x9b   : > { %5643 = vst [vmem:[#allocation28_spill] sm:$0xff] %v3879_v40  ;;  %v3887_v50 = vpop.permute.xlu0 %645 }
  0x9c   : > { %887 = vrot.lane.b32.xlu1 %v564_v25, %s3314_s9 }
  0x9d   : > { %935 = vrot.lane.b32.xlu0 %v540_v48, %s3314_s9  ;;  %v517_v48 = vrot.slane %v3901_v30, 1 }
  0x9e   : > { %v3889_v5 = vpop.permute.xlu1 %643 }
  0x9f   : > { %v3897_v13 = vpop.permute.xlu0 %649  ;;  %v539_v4 = vsel %vm528_vm2, %v516_v35, %v517_v48  ;;  %v495_v35 = vrot.slane %v3939_v49, 1 }
  0xa0   : > { %673 = vrot.lane.b32.xlu1 %v3855_v11, %s3313_s8  ;;  %v3965_v11 = vld [vmem:[#allocation2 + $0x170] sm:$0xff] }
  0xa1   : > { %721 = vrot.lane.b32.xlu0 %v3869_v33, %s3313_s8  ;;  %5652 = vst [vmem:[#allocation37_spill] sm:$0xff] %v3965_v11 }
  0xa2   : > { %v3899_v25 = vpop.permute.xlu1 %651 }
  0xa3   : > { %v3913_v61 = vpop.permute.xlu0 %653 }
  0xa4   : > { %675 = vrot.lane.b32.xlu1 %v3891_v54, %s3313_s8 }
  0xa5   : > { %723 = vrot.lane.b32.xlu0 %v3901_v30, %s3313_s8 }
  0xa6   : > { %v3915_v56 = vpop.permute.xlu1 %655 }
  0xa7   : > { %v3927_v22 = vpop.permute.xlu0 %657 }
  0xa8   : > { %889 = vrot.lane.b32.xlu1 %v563_v29, %s3314_s9  ;;  %v538_v29 = vsel %vm528_vm2, %v517_v48, %v518_v57  ;;  %v3951_v48 = vld [vmem:[#allocation2 + $0xb0] sm:$0xff] }
  0xa9   : > { %937 = vrot.lane.b32.xlu0 %v539_v4, %s3314_s9  ;;  %v3949_v4 = vld [vmem:[#allocation2 + $0x168] sm:$0xff]  ;;  %5651 = vst [vmem:[#allocation36_spill] sm:$0xff] %v3951_v48  ;;  %v496_v30 = vrot.slane %v3951_v48, 1 }
  0xaa   : > { %v3929_v40 = vpop.permute.xlu1 %691  ;;  %5650 = vst [vmem:[#allocation35_spill] sm:$0xff] %v3949_v4 }
  0xab   : > { %v3935_v23 = vpop.permute.xlu0 %693 }
  0xac   : > { %891 = vrot.lane.b32.xlu1 %v562_v53, %s3314_s9 }
  0xad   : > { %939 = vrot.lane.b32.xlu0 %v538_v29, %s3314_s9  ;;  %v519_v29 = vrot.slane %v3949_v4, 1 }
  0xae   : > { %v3937_v42 = vpop.permute.xlu1 %697 }
  0xaf   : > { %v3947_v53 = vpop.permute.xlu0 %859 }
  0xb0   : > { %677 = vrot.lane.b32.xlu1 %v3903_v6, %s3313_s8  ;;  %v561_v6 = vsel %vm528_vm2, %v494_v39, %v495_v35  ;;  %v537_v39 = vsel %vm528_vm2, %v518_v57, %v519_v29 }
  0xb1   : > { %725 = vrot.lane.b32.xlu0 %v3917_v7, %s3313_s8  ;;  %v520_v7 = vrot.slane %v3965_v11, 1 }
  0xb2   : > { %v3945_v18 = vpop.permute.xlu1 %907 }
  0xb3   : > { %v3963_v33 = vpop.permute.xlu0 %699 }
  0xb4   : > { %679 = vrot.lane.b32.xlu1 %v3939_v49, %s3313_s8  ;;  %v560_v49 = vsel %vm528_vm2, %v495_v35, %v496_v30  ;;  %v3987_v35 = vld [vmem:[#allocation2 + $0xb8] sm:$0xff] }
  0xb5   : > { %727 = vrot.lane.b32.xlu0 %v3949_v4, %s3313_s8  ;;  %5653 = vst [vmem:[#allocation38_spill] sm:$0xff] %v3987_v35  ;;  %v497_v57 = vrot.slane %v3987_v35, 1 }
  0xb6   : > { %v3961_v54 = vpop.permute.xlu1 %861 }
  0xb7   : > { %v3977_v51 = vpop.permute.xlu0 %865 }
  0xb8   : > { %893 = vrot.lane.b32.xlu1 %v561_v6, %s3314_s9  ;;  %v536_v6 = vsel %vm528_vm2, %v519_v29, %v520_v7  ;;  %v3999_v29 = vld [vmem:[#allocation2 + $0xc0] sm:$0xff] }
  0xb9   : > { %941 = vrot.lane.b32.xlu0 %v537_v39, %s3314_s9  ;;  %v3997_v39 = vld [vmem:[#allocation2 + $0x178] sm:$0xff]  ;;  %5655 = vst [vmem:[#allocation40_spill] sm:$0xff] %v3999_v29  ;;  %v498_v28 = vrot.slane %v3999_v29, 1 }
  0xba   : > { %v3975_v55 = vpop.permute.xlu1 %909  ;;  %5654 = vst [vmem:[#allocation39_spill] sm:$0xff] %v3997_v39 }
  0xbb   : > { %v3985_v41 = vpop.permute.xlu0 %913 }
  0xbc   : > { %895 = vrot.lane.b32.xlu1 %v560_v49, %s3314_s9 }
  0xbd   : > { %943 = vrot.lane.b32.xlu0 %v536_v6, %s3314_s9  ;;  %v521_v6 = vrot.slane %v3997_v39, 1 }
  0xbe   : > { %v3983_v4 = vpop.permute.xlu1 %867 }
  0xbf   : > { %v3995_v49 = vpop.permute.xlu0 %915 }
  0xc0   : > { %681 = vrot.lane.b32.xlu1 %v3951_v48, %s3313_s8  ;;  %v559_v48 = vsel %vm528_vm2, %v496_v30, %v497_v57  ;;  %v535_v30 = vsel %vm528_vm2, %v520_v7, %v521_v6 }
  0xc1   : > { %729 = vrot.lane.b32.xlu0 %v3965_v11, %s3313_s8  ;;  %v558_v11 = vsel %vm528_vm2, %v497_v57, %v498_v28  ;;  %v4035_v57 = vld [vmem:[#allocation2 + $0xc8] sm:$0xff] }
  0xc2   : > { %v3993_v27 = vpop.permute.xlu1 %695  ;;  %5657 = vst [vmem:[#allocation42_spill] sm:$0xff] %v4035_v57  ;;  %v499_v7 = vrot.slane %v4035_v57, 1 }
  0xc3   : > { %v4011_v20 = vpop.permute.xlu0 %701 }
  0xc4   : > { %683 = vrot.lane.b32.xlu1 %v3987_v35, %s3313_s8  ;;  %v522_v35 = vrot.slane %v4013_v14, 1 }
  0xc5   : > { %731 = vrot.lane.b32.xlu0 %v3997_v39, %s3313_s8 }
  0xc6   : > { %v4009_v44 = vpop.permute.xlu1 %863 }
  0xc7   : > { %v4025_v38 = vpop.permute.xlu0 %911 }
  0xc8   : > { %897 = vrot.lane.b32.xlu1 %v559_v48, %s3314_s9  ;;  %v534_v48 = vsel %vm528_vm2, %v521_v6, %v522_v35  ;;  %v4047_v6 = vld [vmem:[#allocation2 + $0xd0] sm:$0xff] }
  0xc9   : > { %945 = vrot.lane.b32.xlu0 %v535_v30, %s3314_s9  ;;  %v4045_v30 = vld [vmem:[#allocation2 + $0x188] sm:$0xff]  ;;  %v500_v36 = vrot.slane %v4047_v6, 1 }
  0xca   : > { %v4023_v59 = vpop.permute.xlu1 %703  ;;  %5658 = vst [vmem:[#allocation43_spill] sm:$0xff] %v4045_v30 }
  0xcb   : > { %v4033_v37 = vpop.permute.xlu0 %869 }
  0xcc   : > { %899 = vrot.lane.b32.xlu1 %v558_v11, %s3314_s9 }
  0xcd   : > { %947 = vrot.lane.b32.xlu0 %v534_v48, %s3314_s9  ;;  %v523_v48 = vrot.slane %v4045_v30, 1 }
  0xce   : > { %v4031_v39 = vpop.permute.xlu1 %917 }
  0xcf   : > { %v4043_v11 = vpop.permute.xlu0 %871 }
  0xd0   : > { %685 = vrot.lane.b32.xlu1 %v3999_v29, %s3313_s8  ;;  %v557_v29 = vsel %vm528_vm2, %v498_v28, %v499_v7  ;;  %v533_v28 = vsel %vm528_vm2, %v522_v35, %v523_v48 }
  0xd1   : > { %733 = vrot.lane.b32.xlu0 %v4013_v14, %s3313_s8  ;;  %v556_v14 = vsel %vm528_vm2, %v499_v7, %v500_v36  ;;  %v4083_v7 = vld [vmem:[#allocation2 + $0x198] sm:$0xff] }
  0xd2   : > { %v4041_v43 = vpop.permute.xlu1 %919  ;;  %5666 = vst [vmem:[#allocation51_spill] sm:$0xff] %v4083_v7  ;;  %v525_v35 = vrot.slane %v4083_v7, 1 }
  0xd3   : > { %v4059_v21 = vpop.permute.xlu0 %705 }
  0xd4   : > { %687 = vrot.lane.b32.xlu1 %v4035_v57, %s3313_s8  ;;  %5660 = vst [vmem:[#allocation45_spill] sm:$0xff] %v4059_v21  ;;  %v524_v57 = vrot.slane %v4061_v62, 1 }
  0xd5   : > { %735 = vrot.lane.b32.xlu0 %v4045_v30, %s3313_s8 }
  0xd6   : > { %v4057_v58 = vpop.permute.xlu1 %659 }
  0xd7   : > { %5659 = vst [vmem:[#allocation44_spill] sm:$0xff] %v4057_v58  ;;  %v4073_v58 = vpop.permute.xlu0 %707 }
  0xd8   : > { %901 = vrot.lane.b32.xlu1 %v557_v29, %s3314_s9  ;;  %5663 = vst [vmem:[#allocation48_spill] sm:$0xff] %v4073_v58  ;;  %v532_v29 = vsel %vm528_vm2, %v523_v48, %v524_v57  ;;  %v531_v48 = vsel %vm528_vm2, %v524_v57, %v525_v35 }
  0xd9   : > { %949 = vrot.lane.b32.xlu0 %v533_v28, %s3314_s9  ;;  %v4093_v28 = vld [vmem:[#allocation2 + $0x1a0] sm:$0xff] }
  0xda   : > { %v4071_v17 = vpop.permute.xlu1 %873  ;;  %5669 = vst [vmem:[#allocation54_spill] sm:$0xff] %v4093_v28 }
  0xdb   : > { %5662 = vst [vmem:[#allocation47_spill] sm:$0xff] %v4071_v17  ;;  %v4081_v21 = vpop.permute.xlu0 %921  ;;  %v4110_v17 = vld [vmem:[#allocation2 + $0x1a8] sm:$0xff] }
  0xdc   : > { %903 = vrot.lane.b32.xlu1 %v556_v14, %s3314_s9  ;;  %5665 = vst [vmem:[#allocation50_spill] sm:$0xff] %v4081_v21  ;;  %5671 = vst [vmem:[#allocation55_spill] sm:$0xff] %v4110_v17 }
  0xdd   : > { %951 = vrot.lane.b32.xlu0 %v532_v29, %s3314_s9 }
  0xde   : > { %v4079_v30 = vpop.permute.xlu1 %875 }
  0xdf   : > { %5664 = vst [vmem:[#allocation49_spill] sm:$0xff] %v4079_v30  ;;  %v4091_v14 = vpop.permute.xlu0 %923  ;;  %v5670_v30 = vrot.slane %v3555_v45, 1 }
  0xe0   : > { %689 = vrot.lane.b32.xlu1 %v4047_v6, %s3313_s8  ;;  %5668 = vst [vmem:[#allocation53_spill] sm:$0xff] %v4091_v14 }
  0xe1   : > { %737 = vrot.lane.b32.xlu0 %v4061_v62, %s3313_s8  ;;  %v555_v29 = vsel %vm528_vm2, %v500_v36, %v5670_v30  ;;  %v1566_v30 = vld [vmem:[%s5544_s1 + $0x20] sm:$0xf] }
  0xe2   : > { %v4089_v58 = vpop.permute.xlu1 %661  ;;  %3066 = vmatprep.subr.msk.mxu0 %vm1712_vm3, %v1566_v30  ;;  %3148 = vmatprep.subr.msk.mxu1 %vm1712_vm3, %v1566_v30 }
  0xe3   : > { %5667 = vst [vmem:[#allocation52_spill] sm:$0xff] %v4089_v58  ;;  %v526_v58 = vrot.slane %v4093_v28, 1  ;;  %v4108_v14 = vpop.permute.xlu0 %709  ;;  %3067 = vmatpush3.msk.msra.mxu0 %vm1712_vm3, %v1566_v30  ;;  %3153 = vmatpush3.msk.msra.mxu1 %vm1712_vm3, %v1566_v30  ;;  %vm2848_vm3 = vcmask 916480  }
  0xe4   : > { %739 = vrot.lane.b32.xlu1 %v4083_v7, %s3313_s8  ;;  %v527_v7 = vrot.slane %v4110_v17, 1 }
  0xe5   : > { %905 = vrot.lane.b32.xlu0 %v555_v29, %s3314_s9  ;;  %v530_v57 = vsel %vm528_vm2, %v525_v35, %v526_v58 }
  0xe6   : > { %v4106_v21 = vpop.permute.xlu1 %663 }
  0xe7   : > { %v4119_v36 = vpop.permute.xlu0 %711 }
  0xe8   : > { %953 = vrot.lane.b32.xlu1 %v531_v48, %s3314_s9  ;;  %5672 = vst [vmem:[#allocation56_spill] sm:$0xff] %v4119_v36  ;;  %v529_v48 = vsel %vm528_vm2, %v526_v58, %v527_v7  ;;  %v1564_v58 = vld [vmem:[%s5544_s1 + $0x10] sm:$0xff] }
  0xe9   : > { %955 = vrot.lane.b32.xlu0 %v530_v57, %s3314_s9  ;;  %v1565_v57 = vld [vmem:[%s5544_s1 + $0x18] sm:$0xff] }
  0xea   : > { %v4117_v62 = vpop.permute.xlu1 %877  ;;  %3068 = vmatprep.subr.mxu0 %v1565_v57  ;;  %3149 = vmatprep.subr.mxu1 %v1565_v57 }
  0xeb   : > { %v4131_v29 = vpop.permute.xlu0 %925  ;;  %3069 = vmatpush3.msra.mxu0 %v1565_v57  ;;  %3154 = vmatpush3.msra.mxu1 %v1565_v57 }
  0xec   : > { %741 = vrot.lane.b32.xlu1 %v4093_v28, %s3313_s8  ;;  %v5674_v28 = vrot.slane %v3458_v9, 1  ;;  %3070 = vmatprep.subr.mxu0 %v1564_v58 }
  0xed   : > { %743 = vrot.lane.b32.xlu0 %v4110_v17, %s3313_s8  ;;  %v1563_v17 = vld [vmem:[%s5544_s1 + $0x8] sm:$0xff]  ;;  %3150 = vmatprep.subr.mxu1 %v1564_v58  ;;  %s202_s8 = sand.u32 1, %s3294_s16  }
  0xee   : > { %v4129_v35 = vpop.permute.xlu1 %879  ;;  %3071 = vmatpush3.msra.mxu0 %v1564_v58  ;;  %3155 = vmatpush3.msra.mxu1 %v1564_v58  ;;  %s2952_s10 = sshll.u32 %s202_s8, 4 }
  0xef   : > { %5673 = vst [vmem:[#allocation57_spill] sm:$0xff] %v4129_v35  ;;  %v582_v35 = vsel %vm528_vm2, %v527_v7, %v5674_v28  ;;  %v4148_v36 = vpop.permute.xlu0 %927  ;;  %v1019_v7 = vsel %vm215_vm0, %v3598_v0, %v3889_v5  ;;  %3072 = vmatprep.subr.mxu0 %v1563_v17  ;;  %3151 = vmatprep.subr.mxu1 %v1563_v17 }
  0xf0   : > { %957 = vrot.lane.b32.xlu1 %v529_v48, %s3314_s9  ;;  %v1562_v48 = vld [vmem:[%s5544_s1] sm:$0xff]  ;;  %v4175_v0 = vsel %vm1070_vm4, %v1019_v7, %v3947_v53  ;;  %3073 = vmatpush3.msra.mxu0 %v1563_v17 }
  0xf1   : > { %959 = vrot.lane.b32.xlu0 %v582_v35, %s3314_s9  ;;  %v5676_v35 = vrot.slane %v4047_v6, 7  ;;  %3156 = vmatpush3.msra.mxu1 %v1563_v17 }
  0xf2   : > { %v4146_v30 = vpop.permute.xlu1 %665  ;;  %3074 = vmatprep.subr.mxu0 %v1562_v48  ;;  %3152 = vmatprep.subr.mxu1 %v1562_v48 }
  0xf3   : > { %v4162_v57 = vpop.permute.xlu0 %713  ;;  %3075 = vmatpush3.msra.mxu0 %v1562_v48  ;;  %3157 = vmatpush3.msra.mxu1 %v1562_v48 }
  0xf4   : > { %853 = vrot.lane.b32.xlu1 %v3785_v3, %s3314_s9  ;;  %v5675_v3 = vrot.slane %v3555_v45, 7  ;;  %v1020_v45 = vsel %vm215_vm0, %v3588_v60, %v3887_v50  ;;  %v1022_v60 = vsel %vm215_vm0, %v3602_v1, %v3897_v13  ;;  %v1023_v13 = vsel %vm215_vm0, %v3606_v2, %v3899_v25 }
  0xf5   : > { %855 = vrot.lane.b32.xlu0 %v3801_v15, %s3314_s9  ;;  %v4196_v15 = vsel %vm1070_vm4, %v1020_v45, %v3961_v54  ;;  %v4218_v48 = vsel %vm1070_vm4, %v1022_v60, %v3977_v51  ;;  %v4236_v51 = vsel %vm1070_vm4, %v1023_v13, %v3983_v4  ;;  %v5680_v2 = vrot.slane %v3508_v26, 1 }
  0xf6   : > { %v4160_v28 = vpop.permute.xlu1 %667  ;;  %v446_v58 = vsel %vm419_vm1, %v5676_v35, %v5675_v3  ;;  %5677 = vst [vmem:[#allocation58_spill] sm:$0xff] %v4218_v48  ;;  %5678 = vst [vmem:[#allocation59_spill] sm:$0xff] %v4236_v51  ;;  %v1047_v25 = vsel %vm215_vm0, %v3658_v34, %v3963_v33  ;;  %v1045_v26 = vsel %vm215_vm0, %v3671_v32, %v3993_v27 }
  0xf7   : > { %v1043_v5 = vsel %vm215_vm0, %v446_v58, %v3929_v40  ;;  %v4188_v7 = vpop.permute.xlu0 %715  ;;  %v1044_v40 = vsel %vm215_vm0, %v3646_v24, %v3935_v23  ;;  %v1046_v23 = vsel %vm215_vm0, %v3654_v31, %v3937_v42  ;;  %v5681_v31 = vrot.slane %v3467_v10, 1 }
  0xf8   : > { %1173 = vrot.lane.b32.xlu1 %v4175_v0, %s3315_s30  ;;  %v4192_v17 = vsel %vm1070_vm4, %v1043_v5, %v3945_v18  ;;  %v4214_v54 = vsel %vm1070_vm4, %v1044_v40, %v3975_v55  ;;  %v4240_v55 = vsel %vm1070_vm4, %v1046_v23, %v3985_v41  ;;  %v4261_v3 = vsel %vm1070_vm4, %v1047_v25, %v3995_v49  ;;  %v5689_v5 = vld [vmem:[#allocation9_spill] sm:$0xff]  ;;  %v5690_v23 = vld [vmem:[#allocation47_spill] sm:$0xff] }
  0xf9   : > { %1221 = vrot.lane.b32.xlu0 %v4192_v17, %s3315_s30  ;;  %5679 = vst [vmem:[#allocation60_spill] sm:$0xff] %v4240_v55  ;;  %v579_v42 = vsel %vm528_vm2, %v5681_v31, %v5680_v2  ;;  %5682 = vst [vmem:[#allocation61_spill] sm:$0xff] %v4261_v3  ;;  %v1021_v10 = vsel %vm215_vm0, %v3568_v52, %v3865_v63  ;;  %v4282_v35 = vsel %vm1070_vm4, %v1045_v26, %v4025_v38  ;;  %v5692_v31 = vld [vmem:[#allocation50_spill] sm:$0xff]  ;;  %vm2845_vm2 = vcmask 850944  }
  0xfa   : > { %v4186_v53 = vpop.permute.xlu1 %881  ;;  %v4278_v49 = vsel %vm1070_vm4, %v1021_v10, %v4009_v44  ;;  %5683 = vst [vmem:[#allocation62_spill] sm:$0xff] %v4282_v35  ;;  %v1024_v38 = vsel %vm215_vm0, %v3625_v16, %v3913_v61  ;;  %v1048_v44 = vsel %vm215_vm0, %v3676_v46, %v4011_v20  ;;  %v1025_v16 = vsel %vm215_vm0, %v3629_v8, %v3915_v56  ;;  %v5696_v10 = vld [vmem:[#allocation48_spill] sm:$0xff]  ;;  %v5697_v26 = vld [vmem:[#allocation10_spill] sm:$0xff] }
  0xfb   : > { %v4210_v50 = vpop.permute.xlu0 %929  ;;  %v4308_v58 = vsel %vm1070_vm4, %v1048_v44, %v4031_v39  ;;  %v4312_v45 = vsel %vm1070_vm4, %v1024_v38, %v4033_v37  ;;  %v1049_v46 = vsel %vm215_vm0, %v3682_v47, %v4023_v59  ;;  %v4334_v39 = vsel %vm1070_vm4, %v1025_v16, %v4043_v11  ;;  %v5688_v11 = vld [vmem:[#allocation45_spill] sm:$0xff] }
  0xfc   : > { %1175 = vrot.lane.b32.xlu1 %v4196_v15, %s3315_s30  ;;  %5684 = vst [vmem:[#allocation63_spill] sm:$0xff] %v4308_v58  ;;  %5685 = vst [vmem:[#allocation64_spill] sm:$0xff] %v4312_v45  ;;  %v4330_v37 = vsel %vm1070_vm4, %v1049_v46, %v4041_v43  ;;  %v1026_v59 = vsel %vm215_vm0, %v3636_v19, %v3927_v22  ;;  %v1050_v60 = vsel %vm215_vm0, %v5689_v5, %v5688_v11  ;;  %v5694_v22 = vld [vmem:[#allocation44_spill] sm:$0xff]  ;;  %v5698_v46 = vld [vmem:[#allocation49_spill] sm:$0xff] }
  0xfd   : > { %1223 = vrot.lane.b32.xlu0 %v4214_v54, %s3315_s30  ;;  %5686 = vst [vmem:[#allocation65_spill] sm:$0xff] %v4330_v37  ;;  %5687 = vst [vmem:[#allocation66_spill] sm:$0xff] %v4334_v39  ;;  %v4368_v2 = vsel %vm1070_vm4, %v1026_v59, %v5690_v23  ;;  %v5695_v19 = vld [vmem:[#allocation8_spill] sm:$0xff]  ;;  %v1051_v38 = vsel %vm215_vm0, %v5697_v26, %v5696_v10  ;;  %v5700_v11 = vld [vmem:[#allocation53_spill] sm:$0xff] }
  0xfe   : > { %v4208_v18 = vpop.permute.xlu1 %883  ;;  %5691 = vst [vmem:[#allocation45_spill] sm:$0xff] %v4368_v2  ;;  %v1027_v25 = vsel %vm215_vm0, %v5695_v19, %v5694_v22  ;;  %v4394_v5 = vsel %vm1070_vm4, %v1051_v38, %v5700_v11  ;;  %v5702_v19 = vld [vmem:[#allocation16_spill] sm:$0xff] }
  0xff   : > { %v4232_v24 = vpop.permute.xlu0 %931  ;;  %v4390_v59 = vsel %vm1070_vm4, %v1027_v25, %v5698_v46  ;;  %5701 = vst [vmem:[#allocation50_spill] sm:$0xff] %v4394_v5  ;;  %v400_v25 = vrot.slane %v5702_v19, 7  ;;  %v5703_v10 = vld [vmem:[#allocation52_spill] sm:$0xff]  ;;  %v5705_v46 = vld [vmem:[#allocation15_spill] sm:$0xff] }
 0x100   : > { %1320 = vrot.lane.b32.xlu1 %v4218_v48, %s3316_s5  ;;  %5699 = vst [vmem:[#allocation47_spill] sm:$0xff] %v4390_v59  ;;  %v5704_v26 = vld [vmem:[#allocation12_spill] sm:$0xff]  ;;  %v1052_v11 = vsel %vm215_vm0, %v5705_v46, %v4108_v14  ;;  %v5710_v14 = vld [vmem:[#allocation14_spill] sm:$0xff]  ;;  %v5712_v46 = vld [vmem:[#allocation57_spill] sm:$0xff] }
 0x101   : > { %1368 = vrot.lane.b32.xlu0 %v4240_v55, %s3316_s5  ;;  %v1028_v38 = vsel %vm215_vm0, %v5704_v26, %v5703_v10  ;;  %v4437_v10 = vsel %vm1070_vm4, %v1052_v11, %v4131_v29  ;;  %v5711_v26 = vld [vmem:[#allocation56_spill] sm:$0xff] }
 0x102   : > { %v4230_v1 = vpop.permute.xlu1 %669  ;;  %v4429_v19 = vsel %vm1070_vm4, %v1028_v38, %v4117_v62  ;;  %5709 = vst [vmem:[#allocation8_spill] sm:$0xff] %v4437_v10  ;;  %v1029_v62 = vsel %vm215_vm0, %v5710_v14, %v4106_v21  ;;  %v5715_v14 = vld [vmem:[#allocation17_spill] sm:$0xff] }
 0x103   : > { %v4257_v41 = vpop.permute.xlu0 %717  ;;  %5706 = vst [vmem:[#allocation44_spill] sm:$0xff] %v4429_v19  ;;  %v4454_v29 = vsel %vm1070_vm4, %v1029_v62, %v5712_v46 }
 0x104   : > { %1322 = vrot.lane.b32.xlu1 %v4236_v51, %s3316_s5  ;;  %5713 = vst [vmem:[#allocation48_spill] sm:$0xff] %v4454_v29 }
 0x105   : > { %1370 = vrot.lane.b32.xlu0 %v4261_v3, %s3316_s5 }
 0x106   : > { %v4255_v4 = vpop.permute.xlu1 %671 }
 0x107   : > { %v4274_v33 = vpop.permute.xlu0 %719 }
 0x108   : > { %857 = vrot.lane.b32.xlu1 %v579_v42, %s3314_s9  ;;  %v4372_v42 = vsel %vm1070_vm4, %v1050_v60, %v5692_v31 }
 0x109   : > { %1177 = vrot.lane.b32.xlu0 %v4278_v49, %s3315_s30  ;;  %5693 = vst [vmem:[#allocation9_spill] sm:$0xff] %v4372_v42 }
 0x10a   : > { %v4272_v34 = vpop.permute.xlu1 %885 }
 0x10b   : > { %v4290_v32 = vpop.permute.xlu0 %933 }
 0x10c   : > { %1225 = vrot.lane.b32.xlu1 %v4282_v35, %s3315_s30 }
 0x10d   : > { %1179 = vrot.lane.b32.xlu0 %v4218_v48, %s3315_s30  ;;  %v5719_v48 = vld [vmem:[#allocation11_spill] sm:$0xff] }
 0x10e   : > { %v4288_v52 = vpop.permute.xlu1 %887  ;;  %v5720_v35 = vrot.slane %v5719_v48, 7 }
 0x10f   : > { %v4304_v63 = vpop.permute.xlu0 %935 }
 0x110   : > { %1227 = vrot.lane.b32.xlu1 %v4240_v55, %s3315_s30 }
 0x111   : > { %1324 = vrot.lane.b32.xlu0 %v4312_v45, %s3316_s5 }
 0x112   : > { %v4302_v27 = vpop.permute.xlu1 %673 }
 0x113   : > { %v4326_v20 = vpop.permute.xlu0 %721 }
 0x114   : > { %1372 = vrot.lane.b32.xlu1 %v4308_v58, %s3316_s5 }
 0x115   : > { %1326 = vrot.lane.b32.xlu0 %v4334_v39, %s3316_s5 }
 0x116   : > { %v4324_v61 = vpop.permute.xlu1 %675 }
 0x117   : > { %v4342_v8 = vpop.permute.xlu0 %723 }
 0x118   : > { %1374 = vrot.lane.b32.xlu1 %v4330_v37, %s3316_s5 }
 0x119   : > { %1181 = vrot.lane.b32.xlu0 %v4236_v51, %s3315_s30  ;;  %v5718_v51 = vld [vmem:[#allocation20_spill] sm:$0xff] }
 0x11a   : > { %v4340_v56 = vpop.permute.xlu1 %889  ;;  %v402_v55 = vrot.slane %v5718_v51, 7 }
 0x11b   : > { %v4350_v43 = vpop.permute.xlu0 %937 }
 0x11c   : > { %1229 = vrot.lane.b32.xlu1 %v4261_v3, %s3315_s30 }
 0x11d   : > { %1183 = vrot.lane.b32.xlu0 %v4312_v45, %s3315_s30  ;;  %v5716_v45 = vld [vmem:[#allocation18_spill] sm:$0xff] }
 0x11e   : > { %v4348_v47 = vpop.permute.xlu1 %891  ;;  %v401_v3 = vrot.slane %v5716_v45, 7 }
 0x11f   : > { %v4364_v13 = vpop.permute.xlu0 %939 }
 0x120   : > { %1231 = vrot.lane.b32.xlu1 %v4308_v58, %s3315_s30  ;;  %v435_v45 = vsel %vm419_vm1, %v400_v25, %v401_v3 }
 0x121   : > { %1328 = vrot.lane.b32.xlu0 %v4368_v2, %s3316_s5  ;;  %v1054_v51 = vsel %vm215_vm0, %v435_v45, %v4162_v57  ;;  %v5726_v45 = vld [vmem:[#allocation22_spill] sm:$0xff] }
 0x122   : > { %v4362_v40 = vpop.permute.xlu1 %677 }
 0x123   : > { %v4386_v16 = vpop.permute.xlu0 %725 }
 0x124   : > { %1376 = vrot.lane.b32.xlu1 %v4372_v42, %s3316_s5 }
 0x125   : > { %1330 = vrot.lane.b32.xlu0 %v4390_v59, %s3316_s5 }
 0x126   : > { %v4384_v44 = vpop.permute.xlu1 %679 }
 0x127   : > { %v4402_v23 = vpop.permute.xlu0 %727 }
 0x128   : > { %1378 = vrot.lane.b32.xlu1 %v4394_v5, %s3316_s5 }
 0x129   : > { %1185 = vrot.lane.b32.xlu0 %v4334_v39, %s3315_s30 }
 0x12a   : > { %v4400_v60 = vpop.permute.xlu1 %893 }
 0x12b   : > { %v4410_v22 = vpop.permute.xlu0 %941 }
 0x12c   : > { %1233 = vrot.lane.b32.xlu1 %v4330_v37, %s3315_s30 }
 0x12d   : > { %1187 = vrot.lane.b32.xlu0 %v4368_v2, %s3315_s30  ;;  %v5707_v2 = vld [vmem:[#allocation13_spill] sm:$0xff] }
 0x12e   : > { %v4408_v31 = vpop.permute.xlu1 %895  ;;  %v5708_v58 = vrot.slane %v5707_v2, 7 }
 0x12f   : > { %v4425_v39 = vpop.permute.xlu0 %943 }
 0x130   : > { %1235 = vrot.lane.b32.xlu1 %v4372_v42, %s3315_s30  ;;  %v436_v42 = vsel %vm419_vm1, %v5708_v58, %v400_v25 }
 0x131   : > { %1332 = vrot.lane.b32.xlu0 %v4429_v19, %s3316_s5  ;;  %v1053_v2 = vsel %vm215_vm0, %v436_v42, %v5711_v26  ;;  %v377_v26 = vrot.slane %v5715_v14, 7 }
 0x132   : > { %v4423_v37 = vpop.permute.xlu1 %681  ;;  %v4458_v11 = vsel %vm1070_vm4, %v1053_v2, %v4148_v36  ;;  %v5717_v2 = vld [vmem:[#allocation19_spill] sm:$0xff] }
 0x133   : > { %v4450_v58 = vpop.permute.xlu0 %729  ;;  %5714 = vst [vmem:[#allocation10_spill] sm:$0xff] %v4458_v11  ;;  %v378_v46 = vrot.slane %v5717_v2, 7  ;;  %v459_v14 = vsel %vm419_vm1, %v5720_v35, %v377_v26 }
 0x134   : > { %1380 = vrot.lane.b32.xlu1 %v4437_v10, %s3316_s5 }
 0x135   : > { %1334 = vrot.lane.b32.xlu0 %v4454_v29, %s3316_s5  ;;  %v458_v35 = vsel %vm419_vm1, %v377_v26, %v378_v46 }
 0x136   : > { %v4448_v38 = vpop.permute.xlu1 %683  ;;  %v1031_v57 = vsel %vm215_vm0, %v458_v35, %v4160_v28  ;;  %v5727_v35 = vld [vmem:[#allocation23_spill] sm:$0xff] }
 0x137   : > { %v4466_v42 = vpop.permute.xlu0 %731 }
 0x138   : > { %1382 = vrot.lane.b32.xlu1 %v4458_v11, %s3316_s5 }
 0x139   : > { %1189 = vrot.lane.b32.xlu0 %v4390_v59, %s3315_s30 }
 0x13a   : > { %v4464_v21 = vpop.permute.xlu1 %897 }
 0x13b   : > { %v4476_v62 = vpop.permute.xlu0 %945 }
 0x13c   : > { %1237 = vrot.lane.b32.xlu1 %v4394_v5, %s3315_s30  ;;  %v1030_v5 = vsel %vm215_vm0, %v459_v14, %v4146_v30  ;;  %v4508_v30 = vsel %vm1070_vm4, %v1054_v51, %v4210_v50  ;;  %v4524_v50 = vsel %vm1070_vm4, %v1031_v57, %v4208_v18  ;;  %v403_v51 = vrot.slane %v5726_v45, 7 }
 0x13d   : > { %1191 = vrot.lane.b32.xlu0 %v4429_v19, %s3315_s30  ;;  %v4502_v25 = vsel %vm1070_vm4, %v1030_v5, %v4186_v53  ;;  %5722 = vst [vmem:[#allocation53_spill] sm:$0xff] %v4508_v30  ;;  %5723 = vst [vmem:[#allocation16_spill] sm:$0xff] %v4524_v50  ;;  %v380_v57 = vrot.slane %v5727_v35, 7 }
 0x13e   : > { %v4474_v36 = vpop.permute.xlu1 %899  ;;  %5721 = vst [vmem:[#allocation49_spill] sm:$0xff] %v4502_v25 }
 0x13f   : > { %v4496_v48 = vpop.permute.xlu0 %947 }
 0x140   : > { %1239 = vrot.lane.b32.xlu1 %v4437_v10, %s3315_s30  ;;  %v434_v10 = vsel %vm419_vm1, %v401_v3, %v402_v55 }
 0x141   : > { %1336 = vrot.lane.b32.xlu0 %v4502_v25, %s3316_s5  ;;  %v1055_v53 = vsel %vm215_vm0, %v434_v10, %v4188_v7  ;;  %v5725_v10 = vld [vmem:[#allocation21_spill] sm:$0xff] }
 0x142   : > { %v4494_v2 = vpop.permute.xlu1 %685  ;;  %v4528_v3 = vsel %vm1070_vm4, %v1055_v53, %v4232_v24  ;;  %v379_v14 = vrot.slane %v5725_v10, 7  ;;  %v5728_v53 = vld [vmem:[#allocation24_spill] sm:$0xff]  ;;  %v433_v10 = vsel %vm419_vm1, %v402_v55, %v403_v51 }
 0x143   : > { %v4520_v26 = vpop.permute.xlu0 %733  ;;  %5724 = vst [vmem:[#allocation52_spill] sm:$0xff] %v4528_v3  ;;  %v404_v19 = vrot.slane %v5728_v53, 7  ;;  %v1056_v35 = vsel %vm215_vm0, %v433_v10, %v4257_v41 }
 0x144   : > { %1384 = vrot.lane.b32.xlu1 %v4508_v30, %s3316_s5  ;;  %v457_v59 = vsel %vm419_vm1, %v378_v46, %v379_v14  ;;  %v456_v46 = vsel %vm419_vm1, %v379_v14, %v380_v57 }
 0x145   : > { %1338 = vrot.lane.b32.xlu0 %v4524_v50, %s3316_s5  ;;  %v1032_v45 = vsel %vm215_vm0, %v457_v59, %v4230_v1  ;;  %v4576_v1 = vsel %vm1070_vm4, %v1056_v35, %v4290_v32  ;;  %v1033_v41 = vsel %vm215_vm0, %v456_v46, %v4255_v4  ;;  %v5736_v46 = vld [vmem:[#allocation30_spill] sm:$0xff] }
 0x146   : > { %v4518_v5 = vpop.permute.xlu1 %687  ;;  %v4570_v55 = vsel %vm1070_vm4, %v1032_v45, %v4272_v34  ;;  %5730 = vst [vmem:[#allocation15_spill] sm:$0xff] %v4576_v1  ;;  %v4592_v32 = vsel %vm1070_vm4, %v1033_v41, %v4288_v52  ;;  %v5734_v45 = vld [vmem:[#allocation27_spill] sm:$0xff]  ;;  %v382_v41 = vrot.slane %v5736_v46, 7 }
 0x147   : > { %v4536_v7 = vpop.permute.xlu0 %735  ;;  %5729 = vst [vmem:[#allocation12_spill] sm:$0xff] %v4570_v55  ;;  %5731 = vst [vmem:[#allocation13_spill] sm:$0xff] %v4592_v32  ;;  %v405_v35 = vrot.slane %v5734_v45, 7 }
 0x148   : > { %1386 = vrot.lane.b32.xlu1 %v4528_v3, %s3316_s5 }
 0x149   : > { %1193 = vrot.lane.b32.xlu0 %v4454_v29, %s3315_s30 }
 0x14a   : > { %v4534_v28 = vpop.permute.xlu1 %901 }
 0x14b   : > { %v4546_v24 = vpop.permute.xlu0 %949 }
 0x14c   : > { %1241 = vrot.lane.b32.xlu1 %v4458_v11, %s3315_s30 }
 0x14d   : > { %1195 = vrot.lane.b32.xlu0 %v4502_v25, %s3315_s30 }
 0x14e   : > { %v4544_v18 = vpop.permute.xlu1 %903 }
 0x14f   : > { %v4564_v53 = vpop.permute.xlu0 %951 }
 0x150   : > { %1243 = vrot.lane.b32.xlu1 %v4508_v30, %s3315_s30  ;;  %v432_v30 = vsel %vm419_vm1, %v403_v51, %v404_v19 }
 0x151   : > { %1340 = vrot.lane.b32.xlu0 %v4570_v55, %s3316_s5  ;;  %v1057_v34 = vsel %vm215_vm0, %v432_v30, %v4274_v33  ;;  %v5733_v30 = vld [vmem:[#allocation25_spill] sm:$0xff] }
 0x152   : > { %v4562_v11 = vpop.permute.xlu1 %689  ;;  %v4596_v51 = vsel %vm1070_vm4, %v1057_v34, %v4304_v63  ;;  %v381_v10 = vrot.slane %v5733_v30, 7  ;;  %v5737_v34 = vld [vmem:[#allocation31_spill] sm:$0xff]  ;;  %v431_v30 = vsel %vm419_vm1, %v404_v19, %v405_v35 }
 0x153   : > { %v4588_v14 = vpop.permute.xlu0 %737  ;;  %5732 = vst [vmem:[#allocation14_spill] sm:$0xff] %v4596_v51  ;;  %v406_v25 = vrot.slane %v5737_v34, 7  ;;  %v1058_v46 = vsel %vm215_vm0, %v431_v30, %v4326_v20 }
 0x154   : > { %1388 = vrot.lane.b32.xlu1 %v4576_v1, %s3316_s5  ;;  %v455_v29 = vsel %vm419_vm1, %v380_v57, %v381_v10  ;;  %v454_v57 = vsel %vm419_vm1, %v381_v10, %v382_v41 }
 0x155   : > { %1342 = vrot.lane.b32.xlu0 %v4592_v32, %s3316_s5  ;;  %v1034_v45 = vsel %vm215_vm0, %v455_v29, %v4302_v27  ;;  %v4644_v27 = vsel %vm1070_vm4, %v1058_v46, %v4350_v43  ;;  %v1035_v20 = vsel %vm215_vm0, %v454_v57, %v4324_v61  ;;  %v5743_v61 = vld [vmem:[#allocation55_spill] sm:$0xff]  ;;  %v5745_v57 = vld [vmem:[#allocation33_spill] sm:$0xff] }
 0x156   : > { %v4586_v59 = vpop.permute.xlu1 %739  ;;  %v4638_v19 = vsel %vm1070_vm4, %v1034_v45, %v4340_v56  ;;  %5741 = vst [vmem:[#allocation19_spill] sm:$0xff] %v4644_v27  ;;  %v5616_v30 = vrot.slane %v5743_v61, 7  ;;  %v5744_v45 = vld [vmem:[#allocation32_spill] sm:$0xff] }
 0x157   : > { %v4604_v33 = vpop.permute.xlu0 %905  ;;  %5740 = vst [vmem:[#allocation18_spill] sm:$0xff] %v4638_v19  ;;  %v383_v46 = vrot.slane %v5744_v45, 7 }
 0x158   : > { %1390 = vrot.lane.b32.xlu1 %v4596_v51, %s3316_s5 }
 0x159   : > { %1197 = vrot.lane.b32.xlu0 %v4524_v50, %s3315_s30  ;;  %v5748_v50 = vld [vmem:[#allocation34_spill] sm:$0xff] }
 0x15a   : > { %v4602_v4 = vpop.permute.xlu1 %953 }
 0x15b   : > { %v4614_v63 = vpop.permute.xlu0 %955 }
 0x15c   : > { %1245 = vrot.lane.b32.xlu1 %v4528_v3, %s3315_s30 }
 0x15d   : > { %1199 = vrot.lane.b32.xlu0 %v4570_v55, %s3315_s30  ;;  %v407_v55 = vrot.slane %v5745_v57, 7  ;;  %v5749_v57 = vld [vmem:[#allocation38_spill] sm:$0xff] }
 0x15e   : > { %v4612_v52 = vpop.permute.xlu1 %741 }
 0x15f   : > { %5735 = vst [vmem:[#allocation56_spill] sm:$0xff] %v4612_v52  ;;  %v4632_v34 = vpop.permute.xlu0 %743  ;;  %v5751_v52 = vld [vmem:[#allocation35_spill] sm:$0xff] }
 0x160   : > { %1247 = vrot.lane.b32.xlu1 %v4576_v1, %s3315_s30  ;;  %5739 = vst [vmem:[#allocation17_spill] sm:$0xff] %v4632_v34  ;;  %v430_v1 = vsel %vm419_vm1, %v405_v35, %v406_v25  ;;  %v4658_v35 = vsel %vm1070_vm4, %v1035_v20, %v4348_v47  ;;  %v5746_v47 = vrot.slane %v3458_v9, 7  ;;  %v5747_v20 = vld [vmem:[#allocation40_spill] sm:$0xff]  ;;  %v5750_v9 = vld [vmem:[#allocation26_spill] sm:$0xff] }
 0x161   : > { %1344 = vrot.lane.b32.xlu0 %v4638_v19, %s3316_s5  ;;  %v1059_v56 = vsel %vm215_vm0, %v430_v1, %v4342_v8 }
 0x162   : > { %v4630_v3 = vpop.permute.xlu1 %957  ;;  %v4662_v43 = vsel %vm1070_vm4, %v1059_v56, %v4364_v13  ;;  %v473_v13 = vsel %vm419_vm1, %v5616_v30, %v5746_v47  ;;  %v387_v56 = vrot.slane %v5747_v20, 7  ;;  %v408_v47 = vrot.slane %v5751_v52, 7 }
 0x163   : > { %5738 = vst [vmem:[#allocation57_spill] sm:$0xff] %v4630_v3  ;;  %v4654_v10 = vpop.permute.xlu0 %959  ;;  %v386_v3 = vrot.slane %v5749_v57, 7  ;;  %v1016_v61 = vsel %vm215_vm0, %v473_v13, %v5750_v9 }
 0x164   : > { %1392 = vrot.lane.b32.xlu1 %v4644_v27, %s3316_s5  ;;  %5742 = vst [vmem:[#allocation20_spill] sm:$0xff] %v4654_v10  ;;  %v384_v10 = vrot.slane %v5748_v50, 7  ;;  %v5752_v50 = vld [vmem:[#allocation42_spill] sm:$0xff] }
 0x165   : > { %1346 = vrot.lane.b32.xlu0 %v4658_v35, %s3316_s5  ;;  %v388_v20 = vrot.slane %v5752_v50, 7 }
 0x166   : > { %v854_v29 = vpop.permute.xlu1 %853  ;;  %v452_v50 = vsel %vm419_vm1, %v383_v46, %v384_v10 }
 0x167   : > { %v856_v8 = vpop.permute.xlu0 %855 }
 0x168   : > { %1394 = vrot.lane.b32.xlu1 %v4662_v43, %s3316_s5 }
 0x169   : > { %1201 = vrot.lane.b32.xlu0 %v4592_v32, %s3315_s30  ;;  %v453_v32 = vsel %vm419_vm1, %v382_v41, %v383_v46  ;;  %v1071_v41 = vsel %vm1070_vm4, %v1016_v61, %v854_v29  ;;  %v428_v61 = vsel %vm419_vm1, %v407_v55, %v408_v47 }
 0x16a   : > { %v1174_v1 = vpop.permute.xlu1 %1173  ;;  %v1036_v13 = vsel %vm215_vm0, %v453_v32, %v4362_v40  ;;  %v5753_v32 = vld [vmem:[#allocation29_spill] sm:$0xff] }
 0x16b   : > { %v1222_v45 = vpop.permute.xlu0 %1221  ;;  %v1465_v9 = vsel %vm1464_vm5, %v1071_v41, %v1174_v1 }
 0x16c   : > { %1249 = vrot.lane.b32.xlu1 %v4596_v51, %s3315_s30  ;;  %v429_v51 = vsel %vm419_vm1, %v406_v25, %v407_v55  ;;  %v449_v25 = vsel %vm419_vm1, %v386_v3, %v387_v56 }
 0x16d   : > { %1203 = vrot.lane.b32.xlu0 %v4638_v19, %s3315_s30  ;;  %v1060_v52 = vsel %vm215_vm0, %v429_v51, %v4386_v16  ;;  %v4710_v19 = vsel %vm1070_vm4, %v1036_v13, %v4400_v60  ;;  %v5754_v16 = vld [vmem:[#allocation7_spill] sm:$0xff]  ;;  %v1040_v1 = vsel %vm215_vm0, %v449_v25, %v4494_v2  ;;  %v448_v60 = vsel %vm419_vm1, %v387_v56, %v388_v20 }
 0x16e   : > { %v1176_v34 = vpop.permute.xlu1 %1175  ;;  %v4714_v29 = vsel %vm1070_vm4, %v1060_v52, %v4410_v22  ;;  %v1017_v51 = vsel %vm215_vm0, %v5754_v16, %v5753_v32  ;;  %v4732_v22 = vsel %vm1070_vm4, %v1040_v1, %v4534_v28  ;;  %v1037_v2 = vsel %vm215_vm0, %v452_v50, %v4384_v44  ;;  %v5756_v50 = vld [vmem:[#allocation37_spill] sm:$0xff]  ;;  %v5757_v16 = vld [vmem:[#allocation39_spill] sm:$0xff] }
 0x16f   : > { %v1224_v30 = vpop.permute.xlu0 %1223  ;;  %v1489_v55 = vsel %vm1464_vm5, %v4732_v22, %v1222_v45  ;;  %v1061_v56 = vsel %vm215_vm0, %v428_v61, %v4402_v23  ;;  %v4745_v28 = vsel %vm1070_vm4, %v1037_v2, %v4408_v31  ;;  %v5758_v1 = vrot.slane %v4047_v6, 7 }
 0x170   : > { %1251 = vrot.lane.b32.xlu1 %v4644_v27, %s3315_s30  ;;  %v4751_v44 = vsel %vm1070_vm4, %v1061_v56, %v4425_v39 }
 0x171   : > { %1348 = vrot.lane.b32.xlu0 %v4710_v19, %s3316_s5 }
 0x172   : > { %v1321_v27 = vpop.permute.xlu1 %1320 }
 0x173   : > { %v1514_v40 = vsel %vm1513_vm6, %v1465_v9, %v1321_v27  ;;  %v1072_v27 = vsel %vm1070_vm4, %v1017_v51, %v856_v8  ;;  %v1369_v25 = vpop.permute.xlu0 %1368  ;;  %v410_v51 = vrot.slane %v5757_v16, 7 }
 0x174   : > { %1396 = vrot.lane.b32.xlu1 %v4714_v29, %s3316_s5  ;;  %3076 = vmatprep.mubr.msk.f32.mxu0 %vm1567_vm7, %v1514_v40  ;;  %v1466_v46 = vsel %vm1464_vm5, %v1072_v27, %v1176_v34  ;;  %v1538_v13 = vsel %vm1513_vm6, %v1489_v55, %v1369_v25  ;;  %v1041_v34 = vsel %vm215_vm0, %v448_v60, %v4518_v5  ;;  %v5755_v5 = vld [vmem:[#allocation36_spill] sm:$0xff]  ;;  %v409_v40 = vrot.slane %v5756_v50, 7 }
 0x175   : > { %1350 = vrot.lane.b32.xlu0 %v4745_v28, %s3316_s5  ;;  %3112 = vmatprep.mubr.msk.f32.mxu1 %vm1567_vm7, %v1538_v13  ;;  %v4760_v23 = vsel %vm1070_vm4, %v1041_v34, %v4544_v18  ;;  %v385_v52 = vrot.slane %v5755_v5, 7  ;;  %v447_v60 = vsel %vm419_vm1, %v388_v20, %v5758_v1  ;;  %v5759_v20 = vld [vmem:[#allocation28_spill] sm:$0xff] }
 0x176   : > { %v1323_v41 = vpop.permute.xlu1 %1322  ;;  %v1490_v39 = vsel %vm1464_vm5, %v4760_v23, %v1224_v30  ;;  %v427_v61 = vsel %vm419_vm1, %v408_v47, %v409_v40 }
 0x177   : > { %v1515_v8 = vsel %vm1513_vm6, %v1466_v46, %v1323_v41  ;;  %v1371_v31 = vpop.permute.xlu0 %1370  ;;  %v451_v30 = vsel %vm419_vm1, %v384_v10, %v385_v52  ;;  %v450_v47 = vsel %vm419_vm1, %v385_v52, %v386_v3  ;;  %v1062_v55 = vsel %vm215_vm0, %v427_v61, %v4450_v58  ;;  %v5760_v46 = vld [vmem:[#allocation6_spill] sm:$0xff]  ;;  %v5761_v52 = vld [vmem:[#allocation41_spill] sm:$0xff] }
 0x178   : > { %1398 = vrot.lane.b32.xlu1 %v4751_v44, %s3316_s5  ;;  %3077 = vmatmul.mubr.msk.f32.vlgmr.msra.gmra.mxu0 %vm1567_vm7, %v1515_v8  ;;  %v1539_v9 = vsel %vm1513_vm6, %v1490_v39, %v1371_v31  ;;  %v1038_v27 = vsel %vm215_vm0, %v451_v30, %v4423_v37  ;;  %v1018_v25 = vsel %vm215_vm0, %v5760_v46, %v5759_v20 }
 0x179   : > { %1205 = vrot.lane.b32.xlu0 %v4658_v35, %s3315_s30  ;;  %3113 = vmatmul.mubr.msk.f32.vlgmr.msra.gmra.mxu1 %vm1567_vm7, %v1539_v9  ;;  %v4798_v6 = vsel %vm1070_vm4, %v1038_v27, %v4464_v21  ;;  %v426_v37 = vsel %vm419_vm1, %v409_v40, %v410_v51  ;;  %v4807_v57 = vsel %vm1070_vm4, %v1062_v55, %v4476_v62  ;;  %v411_v9 = vrot.slane %v5761_v52, 7  ;;  %v5762_v40 = vld [vmem:[#allocation43_spill] sm:$0xff] }
 0x17a   : > { %v858_v45 = vpop.permute.xlu1 %857  ;;  %v1042_v3 = vsel %vm215_vm0, %v447_v60, %v4562_v11  ;;  %v1039_v41 = vsel %vm215_vm0, %v450_v47, %v4448_v38  ;;  %v1063_v13 = vsel %vm215_vm0, %v426_v37, %v4466_v42 }
 0x17b   : > { %v1178_v18 = vpop.permute.xlu0 %1177  ;;  %v4815_v58 = vsel %vm1070_vm4, %v1042_v3, %v4604_v33  ;;  %v1073_v21 = vsel %vm1070_vm4, %v1018_v25, %v858_v45  ;;  %v4829_v33 = vsel %vm1070_vm4, %v1039_v41, %v4474_v36  ;;  %v4835_v38 = vsel %vm1070_vm4, %v1063_v13, %v4496_v48  ;;  %v5764_v3 = vld [vmem:[#allocation46_spill] sm:$0xff] }
 0x17c   : > { %1253 = vrot.lane.b32.xlu1 %v4662_v43, %s3315_s30  ;;  %v1467_v62 = vsel %vm1464_vm5, %v1073_v21, %v1178_v18  ;;  %v412_v18 = vrot.slane %v5762_v40, 7  ;;  %v413_v21 = vrot.slane %v5764_v3, 7 }
 0x17d   : > { %1207 = vrot.lane.b32.xlu0 %v4710_v19, %s3315_s30 }
 0x17e   : > { %v1226_v32 = vpop.permute.xlu1 %1225  ;;  %v424_v1 = vsel %vm419_vm1, %v411_v9, %v412_v18 }
 0x17f   : > { %v1180_v10 = vpop.permute.xlu0 %1179  ;;  %v1491_v11 = vsel %vm1464_vm5, %v4815_v58, %v1226_v32  ;;  %v425_v32 = vsel %vm419_vm1, %v410_v51, %v411_v9 }
 0x180   : > { %1255 = vrot.lane.b32.xlu1 %v4714_v29, %s3315_s30  ;;  %v1468_v42 = vsel %vm1464_vm5, %v4175_v0, %v1180_v10  ;;  %v1064_v61 = vsel %vm215_vm0, %v425_v32, %v4520_v26  ;;  %v1065_v26 = vsel %vm215_vm0, %v424_v1, %v4536_v7  ;;  %v5763_v7 = vld [vmem:[#allocation62_spill] sm:$0xff] }
 0x181   : > { %1352 = vrot.lane.b32.xlu0 %v4798_v6, %s3316_s5  ;;  %v1119_v60 = vsel %vm1070_vm4, %v1064_v61, %v4546_v24  ;;  %v1120_v55 = vsel %vm1070_vm4, %v1065_v26, %v4564_v53 }
 0x182   : > { %v1228_v2 = vpop.permute.xlu1 %1227 }
 0x183   : > { %v1325_v56 = vpop.permute.xlu0 %1324  ;;  %v1492_v36 = vsel %vm1464_vm5, %v4192_v17, %v1228_v2 }
 0x184   : > { %1400 = vrot.lane.b32.xlu1 %v4807_v57, %s3316_s5  ;;  %v1516_v34 = vsel %vm1513_vm6, %v1467_v62, %v1325_v56  ;;  %v5765_v62 = vld [vmem:[#allocation51_spill] sm:$0xff]  ;;  %v423_v56 = vsel %vm419_vm1, %v412_v18, %v413_v21 }
 0x185   : > { %1354 = vrot.lane.b32.xlu0 %v4829_v33, %s3316_s5  ;;  %3079 = vmatprep.mubr.msk.f32.mxu0 %vm1567_vm7, %v1516_v34  ;;  %v1066_v34 = vsel %vm215_vm0, %v423_v56, %v4588_v14  ;;  %v5780_v56 = vld [vmem:[#allocation65_spill] sm:$0xff] }
 0x186   : > { %v1373_v8 = vpop.permute.xlu1 %1372 }
 0x187   : > { %v1540_v39 = vsel %vm1513_vm6, %v1491_v11, %v1373_v8  ;;  %v1327_v31 = vpop.permute.xlu0 %1326  ;;  %v414_v11 = vrot.slane %v5765_v62, 7  ;;  %v5779_v62 = vld [vmem:[#allocation66_spill] sm:$0xff] }
 0x188   : > { %1402 = vrot.lane.b32.xlu1 %v4835_v38, %s3316_s5  ;;  %3115 = vmatprep.mubr.msk.f32.mxu1 %vm1567_vm7, %v1540_v39  ;;  %v1517_v48 = vsel %vm1513_vm6, %v1468_v42, %v1327_v31  ;;  %v1121_v42 = vsel %vm1070_vm4, %v1066_v34, %v4602_v4  ;;  %v5767_v31 = vld [vmem:[#allocation60_spill] sm:$0xff] }
 0x189   : > { %1209 = vrot.lane.b32.xlu0 %v4745_v28, %s3315_s30  ;;  %3080 = vmatmul.mubr.msk.f32.gmra.mxu0 %vm1567_vm7, %v1517_v48  ;;  %v422_v39 = vsel %vm419_vm1, %v413_v21, %v414_v11 }
 0x18a   : > { %v1375_v45 = vpop.permute.xlu1 %1374  ;;  %v1067_v14 = vsel %vm215_vm0, %v422_v39, %v4586_v59  ;;  %v5769_v59 = vld [vmem:[#allocation61_spill] sm:$0xff] }
 0x18b   : > { %v1541_v5 = vsel %vm1513_vm6, %v1492_v36, %v1375_v45  ;;  %v1182_v0 = vpop.permute.xlu0 %1181  ;;  %v5766_v36 = vld [vmem:[#allocation58_spill] sm:$0xff]  ;;  %v1122_v9 = vsel %vm1070_vm4, %v1067_v14, %v4614_v63 }
 0x18c   : > { %1257 = vrot.lane.b32.xlu1 %v4751_v44, %s3315_s30  ;;  %3116 = vmatmul.mubr.msk.f32.gmra.mxu1 %vm1567_vm7, %v1541_v5  ;;  %v1469_v51 = vsel %vm1464_vm5, %v4196_v15, %v1182_v0  ;;  %v5768_v0 = vld [vmem:[#allocation59_spill] sm:$0xff] }
 0x18d   : > { %1211 = vrot.lane.b32.xlu0 %v4798_v6, %s3315_s30 }
 0x18e   : > { %v1230_v50 = vpop.permute.xlu1 %1229 }
 0x18f   : > { %v1184_v30 = vpop.permute.xlu0 %1183  ;;  %v1493_v27 = vsel %vm1464_vm5, %v4214_v54, %v1230_v50 }
 0x190   : > { %1259 = vrot.lane.b32.xlu1 %v4807_v57, %s3315_s30  ;;  %v1470_v15 = vsel %vm1464_vm5, %v4278_v49, %v1184_v30 }
 0x191   : > { %1356 = vrot.lane.b32.xlu0 %v4732_v22, %s3316_s5 }
 0x192   : > { %v1232_v16 = vpop.permute.xlu1 %1231 }
 0x193   : > { %v1329_v10 = vpop.permute.xlu0 %1328  ;;  %v1494_v20 = vsel %vm1464_vm5, %v5763_v7, %v1232_v16  ;;  %v5770_v16 = vld [vmem:[#allocation54_spill] sm:$0xff] }
 0x194   : > { %1404 = vrot.lane.b32.xlu1 %v1119_v60, %s3316_s5  ;;  %v1518_v47 = vsel %vm1513_vm6, %v1469_v51, %v1329_v10  ;;  %v5771_v10 = vld [vmem:[#allocation56_spill] sm:$0xff] }
 0x195   : > { %1358 = vrot.lane.b32.xlu0 %v4760_v23, %s3316_s5  ;;  %3082 = vmatprep.mubr.msk.f32.mxu0 %vm1567_vm7, %v1518_v47  ;;  %v5773_v47 = vld [vmem:[#allocation55_spill] sm:$0xff] }
 0x196   : > { %v1377_v2 = vpop.permute.xlu1 %1376 }
 0x197   : > { %v1542_v24 = vsel %vm1513_vm6, %v1493_v27, %v1377_v2  ;;  %v1331_v46 = vpop.permute.xlu0 %1330  ;;  %v5772_v2 = vld [vmem:[#allocation57_spill] sm:$0xff] }
 0x198   : > { %1406 = vrot.lane.b32.xlu1 %v1120_v55, %s3316_s5  ;;  %3118 = vmatprep.mubr.msk.f32.mxu1 %vm1567_vm7, %v1542_v24  ;;  %v1519_v37 = vsel %vm1513_vm6, %v1470_v15, %v1331_v46  ;;  %v5774_v24 = vrot.slane %v5773_v47, 7 }
 0x199   : > { %1213 = vrot.lane.b32.xlu0 %v4829_v33, %s3315_s30  ;;  %3083 = vmatmul.mubr.msk.f32.gmra.mxu0 %vm1567_vm7, %v1519_v37 }
 0x19a   : > { %v1379_v25 = vpop.permute.xlu1 %1378 }
 0x19b   : > { %v1543_v53 = vsel %vm1513_vm6, %v1494_v20, %v1379_v25  ;;  %v1186_v49 = vpop.permute.xlu0 %1185  ;;  %v5776_v20 = vld [vmem:[#allocation63_spill] sm:$0xff] }
 0x19c   : > { %1261 = vrot.lane.b32.xlu1 %v4835_v38, %s3315_s30  ;;  %3119 = vmatmul.mubr.msk.f32.gmra.mxu1 %vm1567_vm7, %v1543_v53  ;;  %v5777_v53 = vld [vmem:[#allocation17_spill] sm:$0xff] }
 0x19d   : > { %1215 = vrot.lane.b32.xlu0 %v4732_v22, %s3315_s30  ;;  %v1471_v22 = vsel %vm1464_vm5, %v5766_v36, %v1186_v49 }
 0x19e   : > { %v1234_v41 = vpop.permute.xlu1 %1233 }
 0x19f   : > { %v1188_v8 = vpop.permute.xlu0 %1187  ;;  %v1495_v45 = vsel %vm1464_vm5, %v5767_v31, %v1234_v41  ;;  %v5778_v41 = vld [vmem:[#allocation20_spill] sm:$0xff] }
 0x1a0   : > { %1263 = vrot.lane.b32.xlu1 %v1119_v60, %s3315_s30  ;;  %v1472_v50 = vsel %vm1464_vm5, %v5768_v0, %v1188_v8 }
 0x1a1   : > { %1360 = vrot.lane.b32.xlu0 %v4815_v58, %s3316_s5 }
 0x1a2   : > { %v1236_v13 = vpop.permute.xlu1 %1235 }
 0x1a3   : > { %v1333_v48 = vpop.permute.xlu0 %1332  ;;  %v1496_v40 = vsel %vm1464_vm5, %v5769_v59, %v1236_v13 }
 0x1a4   : > { %1408 = vrot.lane.b32.xlu1 %v1121_v42, %s3316_s5  ;;  %v1520_v52 = vsel %vm1513_vm6, %v1471_v22, %v1333_v48 }
 0x1a5   : > { %1362 = vrot.lane.b32.xlu0 %v4192_v17, %s3316_s5  ;;  %3085 = vmatprep.mubr.msk.f32.mxu0 %vm1567_vm7, %v1520_v52  ;;  %v415_v17 = vrot.slane %v5770_v16, 7 }
 0x1a6   : > { %v1381_v5 = vpop.permute.xlu1 %1380 }
 0x1a7   : > { %v1544_v4 = vsel %vm1513_vm6, %v1495_v45, %v1381_v5  ;;  %v1335_v18 = vpop.permute.xlu0 %1334  ;;  %v421_v60 = vsel %vm419_vm1, %v414_v11, %v415_v17  ;;  %v5781_v45 = vld [vmem:[#allocation45_spill] sm:$0xff] }
 0x1a8   : > { %1410 = vrot.lane.b32.xlu1 %v1122_v9, %s3316_s5  ;;  %3121 = vmatprep.mubr.msk.f32.mxu1 %vm1567_vm7, %v1544_v4  ;;  %v1521_v30 = vsel %vm1513_vm6, %v1472_v50, %v1335_v18  ;;  %v5782_v5 = vld [vmem:[#allocation9_spill] sm:$0xff]  ;;  %v5783_v50 = vld [vmem:[#allocation47_spill] sm:$0xff] }
 0x1a9   : > { %1217 = vrot.lane.b32.xlu0 %v4760_v23, %s3315_s30  ;;  %3086 = vmatmul.mubr.msk.f32.gmra.mxu0 %vm1567_vm7, %v1521_v30  ;;  %v1068_v23 = vsel %vm215_vm0, %v421_v60, %v5771_v10  ;;  %v5786_v10 = vld [vmem:[#allocation8_spill] sm:$0xff] }
 0x1aa   : > { %v1383_v32 = vpop.permute.xlu1 %1382  ;;  %v1123_v26 = vsel %vm1070_vm4, %v1068_v23, %v5772_v2 }
 0x1ab   : > { %v1545_v63 = vsel %vm1513_vm6, %v1496_v40, %v1383_v32  ;;  %v1190_v61 = vpop.permute.xlu0 %1189  ;;  %v5784_v40 = vld [vmem:[#allocation50_spill] sm:$0xff] }
 0x1ac   : > { %1265 = vrot.lane.b32.xlu1 %v1120_v55, %s3315_s30  ;;  %3122 = vmatmul.mubr.msk.f32.gmra.mxu1 %vm1567_vm7, %v1545_v63  ;;  %v420_v55 = vsel %vm419_vm1, %v415_v17, %v5774_v24  ;;  %vm2842_vm1 = vcmask 785408  }
 0x1ad   : > { %1219 = vrot.lane.b32.xlu0 %v4815_v58, %s3315_s30  ;;  %v5775_v58 = vld [vmem:[#allocation64_spill] sm:$0xff]  ;;  %v1069_v3 = vsel %vm215_vm0, %v420_v55, %v5777_v53  ;;  %vm2839_vm0 = vcmask 719872  }
 0x1ae   : > { %v1238_v1 = vpop.permute.xlu1 %1237  ;;  %v1473_v15 = vsel %vm1464_vm5, %v5775_v58, %v1190_v61  ;;  %v5787_v55 = vld [vmem:[#allocation48_spill] sm:$0xff] }
 0x1af   : > { %v1192_v51 = vpop.permute.xlu0 %1191  ;;  %v1497_v46 = vsel %vm1464_vm5, %v5776_v20, %v1238_v1 }
 0x1b0   : > { %1267 = vrot.lane.b32.xlu1 %v1121_v42, %s3315_s30  ;;  %v1474_v11 = vsel %vm1464_vm5, %v5779_v62, %v1192_v51  ;;  %v5785_v51 = vld [vmem:[#allocation44_spill] sm:$0xff]  ;;  %s3328_s30 = smov 96  }
 0x1b1   : > { %1364 = vrot.lane.b32.xlu0 %v4214_v54, %s3316_s5  ;;  %v1124_v54 = vsel %vm1070_vm4, %v1069_v3, %v5778_v41 }
 0x1b2   : > { %v1240_v27 = vpop.permute.xlu1 %1239 }
 0x1b3   : > { %v1337_v25 = vpop.permute.xlu0 %1336  ;;  %v1498_v8 = vsel %vm1464_vm5, %v5780_v56, %v1240_v27 }
 0x1b4   : > { %1412 = vrot.lane.b32.xlu1 %v1123_v26, %s3316_s5  ;;  %v1522_v21 = vsel %vm1513_vm6, %v1473_v15, %v1337_v25  ;;  %v5788_v15 = vld [vmem:[#allocation10_spill] sm:$0xff] }
 0x1b5   : > { %1366 = vrot.lane.b32.xlu0 %v5763_v7, %s3316_s5  ;;  %3088 = vmatprep.mubr.msk.f32.mxu0 %vm1567_vm7, %v1522_v21 }
 0x1b6   : > { %v1385_v37 = vpop.permute.xlu1 %1384 }
 0x1b7   : > { %v1546_v49 = vsel %vm1513_vm6, %v1497_v46, %v1385_v37  ;;  %v1339_v13 = vpop.permute.xlu0 %1338 }
 0x1b8   : > { %1414 = vrot.lane.b32.xlu1 %v1124_v54, %s3316_s5  ;;  %3124 = vmatprep.mubr.msk.f32.mxu1 %vm1567_vm7, %v1546_v49  ;;  %v1523_v39 = vsel %vm1513_vm6, %v1474_v11, %v1339_v13  ;;  %v5789_v54 = vld [vmem:[#allocation49_spill] sm:$0xff] }
 0x1b9   : > { %3089 = vmatmul.mubr.msk.f32.gmra.mxu0 %vm1567_vm7, %v1523_v39  ;;  %v5790_v11 = vld [vmem:[#allocation53_spill] sm:$0xff] }
 0x1ba   : > { %v1387_v34 = vpop.permute.xlu1 %1386 }
 0x1bb   : > { %v1547_v42 = vsel %vm1513_vm6, %v1498_v8, %v1387_v34  ;;  %v1194_v7 = vpop.permute.xlu0 %1193 }
 0x1bc   : > { %3125 = vmatmul.mubr.msk.f32.gmra.mxu1 %vm1567_vm7, %v1547_v42  ;;  %v1475_v48 = vsel %vm1464_vm5, %v5781_v45, %v1194_v7  ;;  %v5791_v42 = vld [vmem:[#allocation16_spill] sm:$0xff] }
 0x1be   : > { %v1242_v36 = vpop.permute.xlu1 %1241 }
 0x1bf   : > { %v1196_v22 = vpop.permute.xlu0 %1195  ;;  %v1499_v14 = vsel %vm1464_vm5, %v5782_v5, %v1242_v36 }
 0x1c0   : > { %v1476_v59 = vsel %vm1464_vm5, %v5783_v50, %v1196_v22  ;;  %v5792_v22 = vld [vmem:[#allocation52_spill] sm:$0xff] }
 0x1c2   : > { %v1244_v31 = vpop.permute.xlu1 %1243 }
 0x1c3   : > { %v1341_v52 = vpop.permute.xlu0 %1340  ;;  %v1500_v18 = vsel %vm1464_vm5, %v5784_v40, %v1244_v31  ;;  %v5794_v40 = vld [vmem:[#allocation15_spill] sm:$0xff] }
 0x1c4   : > { %v1524_v9 = vsel %vm1513_vm6, %v1475_v48, %v1341_v52 }
 0x1c5   : > { %3091 = vmatprep.mubr.msk.f32.mxu0 %vm1567_vm7, %v1524_v9 }
 0x1c6   : > { %v1389_v4 = vpop.permute.xlu1 %1388 }
 0x1c7   : > { %v1548_v0 = vsel %vm1513_vm6, %v1499_v14, %v1389_v4  ;;  %v1343_v32 = vpop.permute.xlu0 %1342 }
 0x1c8   : > { %3127 = vmatprep.mubr.msk.f32.mxu1 %vm1567_vm7, %v1548_v0  ;;  %v1525_v63 = vsel %vm1513_vm6, %v1476_v59, %v1343_v32  ;;  %v5793_v0 = vld [vmem:[#allocation12_spill] sm:$0xff] }
 0x1c9   : > { %3092 = vmatmul.mubr.msk.f32.gmra.mxu0 %vm1567_vm7, %v1525_v63 }
 0x1ca   : > { %v1391_v30 = vpop.permute.xlu1 %1390 }
 0x1cb   : > { %v1549_v16 = vsel %vm1513_vm6, %v1500_v18, %v1391_v30  ;;  %v1198_v17 = vpop.permute.xlu0 %1197 }
 0x1cc   : > { %3128 = vmatmul.mubr.msk.f32.gmra.mxu1 %vm1567_vm7, %v1549_v16  ;;  %v1477_v27 = vsel %vm1464_vm5, %v5785_v51, %v1198_v17  ;;  %v5795_v16 = vld [vmem:[#allocation13_spill] sm:$0xff] }
 0x1ce   : > { %v1246_v61 = vpop.permute.xlu1 %1245 }
 0x1cf   : > { %v1200_v1 = vpop.permute.xlu0 %1199  ;;  %v1501_v23 = vsel %vm1464_vm5, %v5786_v10, %v1246_v61 }
 0x1d0   : > { %v1478_v58 = vsel %vm1464_vm5, %v5787_v55, %v1200_v1  ;;  %v5796_v1 = vld [vmem:[#allocation14_spill] sm:$0xff] }
 0x1d2   : > { %v1248_v60 = vpop.permute.xlu1 %1247 }
 0x1d3   : > { %v1345_v2 = vpop.permute.xlu0 %1344  ;;  %v1502_v20 = vsel %vm1464_vm5, %v5788_v15, %v1248_v60  ;;  %v5798_v15 = vld [vmem:[#allocation19_spill] sm:$0xff] }
 0x1d4   : > { %v1526_v47 = vsel %vm1513_vm6, %v1477_v27, %v1345_v2 }
 0x1d5   : > { %3094 = vmatprep.mubr.msk.f32.mxu0 %vm1567_vm7, %v1526_v47 }
 0x1d6   : > { %v1393_v26 = vpop.permute.xlu1 %1392 }
 0x1d7   : > { %v1550_v24 = vsel %vm1513_vm6, %v1501_v23, %v1393_v26  ;;  %v1347_v46 = vpop.permute.xlu0 %1346 }
 0x1d8   : > { %3130 = vmatprep.mubr.msk.f32.mxu1 %vm1567_vm7, %v1550_v24  ;;  %v1527_v37 = vsel %vm1513_vm6, %v1478_v58, %v1347_v46  ;;  %v5797_v24 = vld [vmem:[#allocation18_spill] sm:$0xff] }
 0x1d9   : > { %3095 = vmatmul.mubr.msk.f32.gmra.mxu0 %vm1567_vm7, %v1527_v37 }
 0x1da   : > { %v1395_v25 = vpop.permute.xlu1 %1394 }
 0x1db   : > { %v1551_v53 = vsel %vm1513_vm6, %v1502_v20, %v1395_v25  ;;  %v1202_v3 = vpop.permute.xlu0 %1201 }
 0x1dc   : > { %3131 = vmatmul.mubr.msk.f32.gmra.mxu1 %vm1567_vm7, %v1551_v53  ;;  %v1479_v62 = vsel %vm1464_vm5, %v5789_v54, %v1202_v3 }
 0x1de   : > { %v1250_v21 = vpop.permute.xlu1 %1249 }
 0x1df   : > { %v1204_v49 = vpop.permute.xlu0 %1203  ;;  %v1503_v56 = vsel %vm1464_vm5, %v5790_v11, %v1250_v21 }
 0x1e0   : > { %v1480_v7 = vsel %vm1464_vm5, %v5791_v42, %v1204_v49 }
 0x1e2   : > { %v1252_v41 = vpop.permute.xlu1 %1251 }
 0x1e3   : > { %v1349_v8 = vpop.permute.xlu0 %1348  ;;  %v1504_v31 = vsel %vm1464_vm5, %v5792_v22, %v1252_v41 }
 0x1e4   : > { %v1528_v34 = vsel %vm1513_vm6, %v1479_v62, %v1349_v8 }
 0x1e5   : > { %3097 = vmatprep.mubr.msk.f32.mxu0 %vm1567_vm7, %v1528_v34 }
 0x1e6   : > { %v1397_v13 = vpop.permute.xlu1 %1396 }
 0x1e7   : > { %v1552_v39 = vsel %vm1513_vm6, %v1503_v56, %v1397_v13  ;;  %v1351_v36 = vpop.permute.xlu0 %1350 }
 0x1e8   : > { %3133 = vmatprep.mubr.msk.f32.mxu1 %vm1567_vm7, %v1552_v39  ;;  %v1529_v45 = vsel %vm1513_vm6, %v1480_v7, %v1351_v36 }
 0x1e9   : > { %3098 = vmatmul.mubr.msk.f32.gmra.mxu0 %vm1567_vm7, %v1529_v45 }
 0x1ea   : > { %v1399_v48 = vpop.permute.xlu1 %1398 }
 0x1eb   : > { %v1553_v5 = vsel %vm1513_vm6, %v1504_v31, %v1399_v48  ;;  %v1206_v14 = vpop.permute.xlu0 %1205 }
 0x1ec   : > { %3134 = vmatmul.mubr.msk.f32.gmra.mxu1 %vm1567_vm7, %v1553_v5  ;;  %v1481_v50 = vsel %vm1464_vm5, %v5793_v0, %v1206_v14 }
 0x1ee   : > { %v1254_v52 = vpop.permute.xlu1 %1253 }
 0x1ef   : > { %v1208_v4 = vpop.permute.xlu0 %1207  ;;  %v1505_v18 = vsel %vm1464_vm5, %v5794_v40, %v1254_v52 }
 0x1f0   : > { %v1482_v17 = vsel %vm1464_vm5, %v5795_v16, %v1208_v4 }
 0x1f2   : > { %v1256_v9 = vpop.permute.xlu1 %1255 }
 0x1f3   : > { %v1353_v59 = vpop.permute.xlu0 %1352  ;;  %v1506_v60 = vsel %vm1464_vm5, %v5796_v1, %v1256_v9 }
 0x1f4   : > { %v1530_v32 = vsel %vm1513_vm6, %v1481_v50, %v1353_v59 }
 0x1f5   : > { %3100 = vmatprep.mubr.msk.f32.mxu0 %vm1567_vm7, %v1530_v32 }
 0x1f6   : > { %v1401_v30 = vpop.permute.xlu1 %1400 }
 0x1f7   : > { %v1554_v63 = vsel %vm1513_vm6, %v1505_v18, %v1401_v30  ;;  %v1355_v61 = vpop.permute.xlu0 %1354 }
 0x1f8   : > { %3136 = vmatprep.mubr.msk.f32.mxu1 %vm1567_vm7, %v1554_v63  ;;  %v1531_v51 = vsel %vm1513_vm6, %v1482_v17, %v1355_v61 }
 0x1f9   : > { %3101 = vmatmul.mubr.msk.f32.gmra.mxu0 %vm1567_vm7, %v1531_v51 }
 0x1fa   : > { %v1403_v27 = vpop.permute.xlu1 %1402 }
 0x1fb   : > { %v1555_v10 = vsel %vm1513_vm6, %v1506_v60, %v1403_v27  ;;  %v1210_v23 = vpop.permute.xlu0 %1209 }
 0x1fc   : > { %3137 = vmatmul.mubr.msk.f32.gmra.mxu1 %vm1567_vm7, %v1555_v10  ;;  %v1483_v55 = vsel %vm1464_vm5, %v5797_v24, %v1210_v23  ;;  %v5102_v10 = vld [vmem:[%s5546_s3] ss:$0 sm:$0xff] }
 0x1fe   : > { %v1258_v2 = vpop.permute.xlu1 %1257 }
 0x1ff   : > { %v1212_v26 = vpop.permute.xlu0 %1211  ;;  %v1507_v20 = vsel %vm1464_vm5, %v5798_v15, %v1258_v2 }
 0x200   : > { %v1484_v53 = vsel %vm1464_vm5, %v4658_v35, %v1212_v26 }
 0x202   : > { %v1260_v47 = vpop.permute.xlu1 %1259 }
 0x203   : > { %v1357_v58 = vpop.permute.xlu0 %1356  ;;  %v1508_v21 = vsel %vm1464_vm5, %v4662_v43, %v1260_v47 }
 0x204   : > { %v1532_v46 = vsel %vm1513_vm6, %v1483_v55, %v1357_v58 }
 0x205   : > { %3103 = vmatprep.mubr.msk.f32.mxu0 %vm1567_vm7, %v1532_v46 }
 0x206   : > { %v1405_v25 = vpop.permute.xlu1 %1404 }
 0x207   : > { %v1556_v37 = vsel %vm1513_vm6, %v1507_v20, %v1405_v25  ;;  %v1359_v3 = vpop.permute.xlu0 %1358 }
 0x208   : > { %3139 = vmatprep.mubr.msk.f32.mxu1 %vm1567_vm7, %v1556_v37  ;;  %v1533_v49 = vsel %vm1513_vm6, %v1484_v53, %v1359_v3 }
 0x209   : > { %3104 = vmatmul.mubr.msk.f32.gmra.mxu0 %vm1567_vm7, %v1533_v49 }
 0x20a   : > { %v1407_v41 = vpop.permute.xlu1 %1406 }
 0x20b   : > { %v1557_v54 = vsel %vm1513_vm6, %v1508_v21, %v1407_v41  ;;  %v1214_v62 = vpop.permute.xlu0 %1213 }
 0x20c   : > { %3140 = vmatmul.mubr.msk.f32.gmra.mxu1 %vm1567_vm7, %v1557_v54  ;;  %v1485_v35 = vsel %vm1464_vm5, %v4710_v19, %v1214_v62 }
 0x20e   : > { %v1262_v11 = vpop.permute.xlu1 %1261 }
 0x20f   : > { %v1216_v56 = vpop.permute.xlu0 %1215  ;;  %v1509_v43 = vsel %vm1464_vm5, %v4714_v29, %v1262_v11 }
 0x210   : > { %v1486_v7 = vsel %vm1464_vm5, %v4745_v28, %v1216_v56 }
 0x212   : > { %v1264_v8 = vpop.permute.xlu1 %1263 }
 0x213   : > { %v1361_v13 = vpop.permute.xlu0 %1360  ;;  %v1510_v19 = vsel %vm1464_vm5, %v4751_v44, %v1264_v8 }
 0x214   : > { %v1534_v34 = vsel %vm1513_vm6, %v1485_v35, %v1361_v13 }
 0x215   : > { %3106 = vmatprep.mubr.msk.f32.mxu0 %vm1567_vm7, %v1534_v34 }
 0x216   : > { %v1409_v39 = vpop.permute.xlu1 %1408 }
 0x217   : > { %v1558_v42 = vsel %vm1513_vm6, %v1509_v43, %v1409_v39  ;;  %v1363_v36 = vpop.permute.xlu0 %1362 }
 0x218   : > { %3142 = vmatprep.mubr.msk.f32.mxu1 %vm1567_vm7, %v1558_v42  ;;  %v1535_v22 = vsel %vm1513_vm6, %v1486_v7, %v1363_v36 }
 0x219   : > { %3107 = vmatmul.mubr.msk.f32.gmra.mxu0 %vm1567_vm7, %v1535_v22 }
 0x21a   : > { %v1411_v31 = vpop.permute.xlu1 %1410 }
 0x21b   : > { %v1559_v29 = vsel %vm1513_vm6, %v1510_v19, %v1411_v31  ;;  %v1218_v45 = vpop.permute.xlu0 %1217 }
 0x21c   : > { %3143 = vmatmul.mubr.msk.f32.gmra.mxu1 %vm1567_vm7, %v1559_v29  ;;  %v1487_v28 = vsel %vm1464_vm5, %v4798_v6, %v1218_v45 }
 0x21e   : > { %v1266_v48 = vpop.permute.xlu1 %1265 }
 0x21f   : > { %v1220_v5 = vpop.permute.xlu0 %1219  ;;  %v1511_v44 = vsel %vm1464_vm5, %v4807_v57, %v1266_v48 }
 0x220   : > { %v1488_v50 = vsel %vm1464_vm5, %v4829_v33, %v1220_v5 }
 0x222   : > { %v1268_v14 = vpop.permute.xlu1 %1267 }
 0x223   : > { %v1365_v52 = vpop.permute.xlu0 %1364  ;;  %v1512_v6 = vsel %vm1464_vm5, %v4835_v38, %v1268_v14  ;;  %v5096_v38 = vld [vmem:[%s5545_s2] ss:$0 sm:$0xff] }
 0x224   : > { %v1536_v4 = vsel %vm1513_vm6, %v1487_v28, %v1365_v52 }
 0x225   : > { %3109 = vmatprep.mubr.msk.f32.mxu0 %vm1567_vm7, %v1536_v4 }
 0x226   : > { %v1413_v9 = vpop.permute.xlu1 %1412 }
 0x227   : > { %v1560_v0 = vsel %vm1513_vm6, %v1511_v44, %v1413_v9  ;;  %v1367_v59 = vpop.permute.xlu0 %1366 }
 0x228   : > { %3145 = vmatprep.mubr.msk.f32.mxu1 %vm1567_vm7, %v1560_v0  ;;  %v1537_v40 = vsel %vm1513_vm6, %v1488_v50, %v1367_v59 }
 0x229   : > { %3110 = vmatmul.mubr.msk.f32.gmra.mxu0 %vm1567_vm7, %v1537_v40 }
 0x22a   : > { %v1415_v18 = vpop.permute.xlu1 %1414 }
 0x22b   : > { %v1561_v57 = vsel %vm1513_vm6, %v1512_v6, %v1415_v18 }
 0x22c   : > { %3146 = vmatmul.mubr.msk.f32.gmra.mxu1 %vm1567_vm7, %v1561_v57  ;;  %v3317_v57 = vmov 1983009808  }
 0x238   : > { %v3078_v32 = vpop.f32.mrf.mxu0 }
 0x239   : > { %v3114_v30 = vpop.f32.mrf.mxu1  ;;  %v2013_v27 = vmul.f32 %v3078_v32, %v5096_v38  ;;  %v2150_v32 = vunpack.c.l.s4 %v3317_v57 }
 0x23a   : > { %v1782_v63 = vpop.f32.mrf.mxu0  ;;  %v2029_v23 = vmul.f32 %v3114_v30, %v5096_v38 }
 0x23b   : > { %v1894_v16 = vpop.f32.mrf.mxu1  ;;  %v2012_v2 = vmul.f32 %v5096_v38, %v1782_v63  ;;  %v2052_v24 = vadd.f32 %v5102_v10, %v2013_v27 }
 0x23c   : > { %v2028_v26 = vmul.f32 %v5096_v38, %v1894_v16  ;;  %v2068_v58 = vadd.f32 %v5102_v10, %v2029_v23  ;;  %v2151_v23 = vunpack.c.0.s8 %v2150_v32 }
 0x23d   : > { %v2051_v20 = vadd.f32 %v5102_v10, %v2012_v2  ;;  %v2084_v21 = vmax.f32 %v2052_v24, 0.0 }
 0x23e   : > { %v2067_v37 = vadd.f32 %v5102_v10, %v2028_v26  ;;  %v2100_v62 = vmax.f32 %v2068_v58, 0.0 }
 0x23f   : > { %v2083_v8 = vmax.f32 %v2051_v20, 0.0  ;;  %v5123_v42 = vmin.f32 %v2084_v21, 6.0 }
 0x240   : > { %v2099_v43 = vmax.f32 %v2067_v37, 0.0  ;;  %v5127_v19 = vmin.f32 %v2100_v62, 6.0 }
 0x241   : > { %v2115_v29 = vmin.f32 %v2083_v8, 6.0 }
 0x242   : > { %v2131_v14 = vmin.f32 %v2099_v43, 6.0 }
 0x249   : > { %v3081_v17 = vpop.f32.mrf.mxu0 }
 0x24a   : > { %v2014_v4 = vmul.f32 %v3081_v17, %v5096_v38 }
 0x24b   : > { %v1792_v33 = vpop.f32.mrf.mxu0 }
 0x24c   : > { %v3117_v61 = vpop.f32.mrf.mxu1  ;;  %v2053_v40 = vadd.f32 %v5102_v10, %v2014_v4 }
 0x24d   : > { %v2030_v9 = vmul.f32 %v3117_v61, %v5096_v38 }
 0x24e   : > { %v1904_v1 = vpop.f32.mrf.mxu1 }
 0x24f   : > { %v2069_v18 = vadd.f32 %v5102_v10, %v2030_v9 }
 0x251   : > { %v2101_v61 = vmax.f32 %v2069_v18, 0.0 }
 0x253   : > { %v2133_v58 = vmin.f32 %v2101_v61, 6.0 }
 0x259   : > { %v3084_v60 = vpop.f32.mrf.mxu0 }
 0x25a   : > { %v2085_v60 = vmax.f32 %v2053_v40, 0.0 }
 0x25b   : > { %v5107_v47 = vpop.f32.mrf.mxu0 }
 0x25c   : > { %v3120_v51 = vpop.f32.mrf.mxu1  ;;  %v2117_v24 = vmin.f32 %v2085_v60, 6.0 }
 0x25e   : > { %v5110_v55 = vpop.f32.mrf.mxu1 }
 0x25f   : > { %v2031_v8 = vmul.f32 %v5096_v38, %v5110_v55 }
 0x261   : > { %v2070_v4 = vadd.f32 %v5102_v10, %v2031_v8 }
 0x263   : > { %v2102_v40 = vmax.f32 %v2070_v4, 0.0 }
 0x269   : > { %v3087_v15 = vpop.f32.mrf.mxu0 }
 0x26a   : > { %v2017_v46 = vmul.f32 %v3087_v15, %v5096_v38 }
 0x26b   : > { %v1810_v3 = vpop.f32.mrf.mxu0 }
 0x26c   : > { %v3123_v25 = vpop.f32.mrf.mxu1  ;;  %v2056_v49 = vadd.f32 %v5102_v10, %v2017_v46  ;;  %v2016_v41 = vmul.f32 %v5096_v38, %v1810_v3  ;;  %v5148_v46 = vsub.s32 %v2151_v23, %v3471_v12 }
 0x26d   : > { %v2033_v53 = vmul.f32 %v3123_v25, %v5096_v38 }
 0x26e   : > { %v1922_v54 = vpop.f32.mrf.mxu1  ;;  %v2088_v35 = vmax.f32 %v2056_v49, 0.0  ;;  %v2055_v13 = vadd.f32 %v5102_v10, %v2016_v41 }
 0x26f   : > { %v2072_v11 = vadd.f32 %v5102_v10, %v2033_v53  ;;  %v2032_v56 = vmul.f32 %v5096_v38, %v1922_v54 }
 0x270   : > { %v5125_v7 = vmin.f32 %v2088_v35, 6.0  ;;  %v2087_v36 = vmax.f32 %v2055_v13, 0.0 }
 0x271   : > { %v2104_v34 = vmax.f32 %v2072_v11, 0.0  ;;  %v2071_v39 = vadd.f32 %v5102_v10, %v2032_v56  ;;  %v2015_v56 = vmul.f32 %v5096_v38, %v5107_v47 }
 0x272   : > { %v2419_v45 = vcombine.low %v5123_v42, %v5125_v7  ;;  %v2420_v48 = vcombine.high %v5123_v42, %v5125_v7  ;;  %v2119_v5 = vmin.f32 %v2087_v36, 6.0 }
 0x273   : > { %v5129_v22 = vmin.f32 %v2104_v34, 6.0  ;;  %v2103_v31 = vmax.f32 %v2071_v39, 0.0 }
 0x274   : > { %v2147_v0 = vcombine.low %v2115_v29, %v2119_v5  ;;  %v2148_v50 = vcombine.high %v2115_v29, %v2119_v5  ;;  %v5210_v23 = vrot.slane %v2420_v48, %v5148_v46 }
 0x275   : > { %v2555_v28 = vcombine.low %v5127_v19, %v5129_v22  ;;  %v2556_v52 = vcombine.high %v5127_v19, %v5129_v22  ;;  %v2135_v44 = vmin.f32 %v2103_v31, 6.0 }
 0x276   : > { %v5151_v21 = vrot.slane %v2147_v0, %v5148_v46  ;;  %v5154_v49 = vrot.slane %v2148_v50, %v5148_v46 }
 0x277   : > { %v2283_v59 = vcombine.low %v2131_v14, %v2135_v44  ;;  %v2284_v6 = vcombine.high %v2131_v14, %v2135_v44  ;;  %v2054_v44 = vadd.f32 %v5102_v10, %v2015_v56  ;;  %v5234_v42 = vrot.slane %v2556_v52, %v5148_v46 }
 0x279   : > { %v3090_v30 = vpop.f32.mrf.mxu0  ;;  %v5173_v35 = vrot.slane %v2283_v59, %v5148_v46  ;;  %v5176_v13 = vrot.slane %v2284_v6, %v5148_v46  ;;  %v2086_v6 = vmax.f32 %v2054_v44, 0.0 }
 0x27a   : > { %v2018_v16 = vmul.f32 %v3090_v30, %v5096_v38 }
 0x27b   : > { %v1820_v1 = vpop.f32.mrf.mxu0 }
 0x27c   : > { %v3126_v63 = vpop.f32.mrf.mxu1  ;;  %v2057_v51 = vadd.f32 %v5102_v10, %v2018_v16  ;;  %v2134_v16 = vmin.f32 %v2102_v40, 6.0 }
 0x27d   : > { %v2034_v33 = vmul.f32 %v3126_v63, %v5096_v38  ;;  %v2118_v63 = vmin.f32 %v2086_v6, 6.0  ;;  %v3318_v6 = vmov 1934713408  }
 0x27e   : > { %v1932_v17 = vpop.f32.mrf.mxu1  ;;  %v2089_v2 = vmax.f32 %v2057_v51, 0.0  ;;  %v2214_v40 = vunpack.c.l.s4 %v3318_v6 }
 0x27f   : > { %v2073_v27 = vadd.f32 %v5102_v10, %v2034_v33 }
 0x280   : > { %v2121_v15 = vmin.f32 %v2089_v2, 6.0 }
 0x281   : > { %v2105_v26 = vmax.f32 %v2073_v27, 0.0  ;;  %v5204_v27 = vrot.slane %v2419_v45, %v5148_v46  ;;  %v5228_v45 = vrot.slane %v2555_v28, %v5148_v46 }
 0x282   : > { %v2163_v25 = vcombine.low %v2117_v24, %v2121_v15  ;;  %v2164_v37 = vcombine.high %v2117_v24, %v2121_v15 }
 0x283   : > { %v2137_v20 = vmin.f32 %v2105_v26, 6.0 }
 0x284   : > { %v5157_v41 = vrot.slane %v2163_v25, %v5148_v46  ;;  %v5160_v54 = vrot.slane %v2164_v37, %v5148_v46 }
 0x285   : > { %v2299_v53 = vcombine.low %v2133_v58, %v2137_v20  ;;  %v2300_v3 = vcombine.high %v2133_v58, %v2137_v20 }
 0x286   : > { %v2211_v43 = vcombine.low %v5151_v21, %v5157_v41  ;;  %v2212_v34 = vcombine.high %v5151_v21, %v5157_v41  ;;  %v2227_v39 = vcombine.low %v5154_v49, %v5160_v54  ;;  %v2228_v47 = vcombine.high %v5154_v49, %v5160_v54 }
 0x287   : > { %v5163_v62 = vrot.slane %v2299_v53, %v5148_v46  ;;  %v5166_v11 = vrot.slane %v2300_v3, %v5148_v46 }
 0x289   : > { %v2347_v55 = vcombine.low %v5173_v35, %v5163_v62  ;;  %v2348_v36 = vcombine.high %v5173_v35, %v5163_v62  ;;  %v2363_v31 = vcombine.low %v5176_v13, %v5166_v11  ;;  %v2364_v29 = vcombine.high %v5176_v13, %v5166_v11  ;;  %v3093_v5 = vpop.f32.mrf.mxu0 }
 0x28b   : > { %v1829_v9 = vpop.f32.mrf.mxu0 }
 0x28c   : > { %v3129_v14 = vpop.f32.mrf.mxu1  ;;  %v2019_v50 = vmul.f32 %v5096_v38, %v1829_v9 }
 0x28e   : > { %v1941_v0 = vpop.f32.mrf.mxu1  ;;  %v2058_v18 = vadd.f32 %v5102_v10, %v2019_v50 }
 0x28f   : > { %v2035_v59 = vmul.f32 %v5096_v38, %v1941_v0 }
 0x290   : > { %v2090_v32 = vmax.f32 %v2058_v18, 0.0 }
 0x291   : > { %v2074_v57 = vadd.f32 %v5102_v10, %v2035_v59 }
 0x292   : > { %v2122_v33 = vmin.f32 %v2090_v32, 6.0  ;;  %v2215_v32 = vunpack.c.0.s8 %v2214_v40 }
 0x293   : > { %v2106_v30 = vmax.f32 %v2074_v57, 0.0 }
 0x294   : > { %v2435_v17 = vcombine.low %v2118_v63, %v2122_v33  ;;  %v2436_v60 = vcombine.high %v2118_v63, %v2122_v33  ;;  %v5260_v33 = vsub.s32 %v2215_v32, %v3471_v12 }
 0x295   : > { %v2138_v1 = vmin.f32 %v2106_v30, 6.0 }
 0x296   : > { %v5213_v2 = vrot.slane %v2435_v17, %v5148_v46  ;;  %v5216_v26 = vrot.slane %v2436_v60, %v5148_v46  ;;  %v5298_v21 = vrot.slane %v2348_v36, %v5260_v33  ;;  %v5304_v41 = vrot.slane %v2228_v47, %v5260_v33 }
 0x297   : > { %v2571_v61 = vcombine.low %v2134_v16, %v2138_v1  ;;  %v2572_v51 = vcombine.high %v2134_v16, %v2138_v1  ;;  %v5317_v62 = vrot.slane %v2364_v29, %v5260_v33 }
 0x298   : > { %v2483_v7 = vcombine.low %v5204_v27, %v5213_v2  ;;  %v2484_v48 = vcombine.high %v5204_v27, %v5213_v2  ;;  %v2499_v15 = vcombine.low %v5210_v23, %v5216_v26  ;;  %v2500_v20 = vcombine.high %v5210_v23, %v5216_v26 }
 0x299   : > { %v5219_v24 = vrot.slane %v2571_v61, %v5148_v46  ;;  %v5222_v58 = vrot.slane %v2572_v51, %v5148_v46  ;;  %v3096_v25 = vpop.f32.mrf.mxu0 }
 0x29a   : > { %v2021_v49 = vmul.f32 %v3096_v25, %v5096_v38 }
 0x29b   : > { %v2619_v28 = vcombine.low %v5228_v45, %v5219_v24  ;;  %v2620_v19 = vcombine.high %v5228_v45, %v5219_v24  ;;  %v2635_v22 = vcombine.low %v5234_v42, %v5222_v58  ;;  %v2636_v52 = vcombine.high %v5234_v42, %v5222_v58  ;;  %v1838_v53 = vpop.f32.mrf.mxu0 }
 0x29c   : > { %v3132_v37 = vpop.f32.mrf.mxu1  ;;  %v2020_v16 = vmul.f32 %v5096_v38, %v1838_v53  ;;  %v5272_v53 = vrot.slane %v2211_v43, %v5260_v33  ;;  %v5292_v43 = vrot.slane %v2347_v55, %v5260_v33  ;;  %v5311_v55 = vrot.slane %v2363_v31, %v5260_v33 }
 0x29d   : > { %v2037_v54 = vmul.f32 %v3132_v37, %v5096_v38  ;;  %v5334_v37 = vrot.slane %v2484_v48, %v5260_v33  ;;  %v5353_v27 = vrot.slane %v2635_v22, %v5260_v33  ;;  %v2060_v2 = vadd.f32 %v5102_v10, %v2021_v49 }
 0x29e   : > { %v1950_v3 = vpop.f32.mrf.mxu1  ;;  %v5363_v22 = vrot.slane %v2499_v15, %v5260_v33  ;;  %v5380_v15 = vrot.slane %v2500_v20, %v5260_v33 }
 0x29f   : > { %v2036_v1 = vmul.f32 %v5096_v38, %v1950_v3 }
 0x2a1   : > { %v2075_v12 = vadd.f32 %v5102_v10, %v2036_v1 }
 0x2a9   : > { %v3099_v56 = vpop.f32.mrf.mxu0 }
 0x2aa   : > { %v2022_v17 = vmul.f32 %v3099_v56, %v5096_v38  ;;  %v5280_v56 = vrot.slane %v2212_v34, %v5260_v33 }
 0x2ab   : > { %v1848_v5 = vpop.f32.mrf.mxu0 }
 0x2ac   : > { %v3135_v8 = vpop.f32.mrf.mxu1  ;;  %v2059_v5 = vadd.f32 %v5102_v10, %v2020_v16  ;;  %v2061_v3 = vadd.f32 %v5102_v10, %v2022_v17  ;;  %v5347_v16 = vrot.slane %v2620_v19, %v5260_v33 }
 0x2ad   : > { %v2038_v61 = vmul.f32 %v3135_v8, %v5096_v38  ;;  %v5286_v8 = vrot.slane %v2227_v39, %v5260_v33 }
 0x2ae   : > { %v1960_v14 = vpop.f32.mrf.mxu1  ;;  %v2091_v35 = vmax.f32 %v2059_v5, 0.0  ;;  %v2093_v6 = vmax.f32 %v2061_v3, 0.0  ;;  %v2076_v5 = vadd.f32 %v5102_v10, %v2037_v54 }
 0x2af   : > { %v2077_v34 = vadd.f32 %v5102_v10, %v2038_v61 }
 0x2b0   : > { %v2125_v1 = vmin.f32 %v2093_v6, 6.0 }
 0x2b9   : > { %v3102_v44 = vpop.f32.mrf.mxu0 }
 0x2bb   : > { %v5252_v9 = vpop.f32.mrf.mxu0 }
 0x2bc   : > { %v3138_v4 = vpop.f32.mrf.mxu1 }
 0x2bd   : > { %v2107_v4 = vmax.f32 %v2075_v12, 0.0  ;;  %v2023_v12 = vmul.f32 %v5096_v38, %v5252_v9 }
 0x2be   : > { %v5254_v0 = vpop.f32.mrf.mxu1 }
 0x2bf   : > { %v2139_v48 = vmin.f32 %v2107_v4, 6.0 }
 0x2c9   : > { %v3105_v50 = vpop.f32.mrf.mxu0 }
 0x2ca   : > { %v2025_v11 = vmul.f32 %v3105_v50, %v5096_v38  ;;  %v2123_v50 = vmin.f32 %v2091_v35, 6.0  ;;  %v2108_v35 = vmax.f32 %v2076_v5, 0.0 }
 0x2cb   : > { %v1866_v18 = vpop.f32.mrf.mxu0 }
 0x2cc   : > { %v3141_v59 = vpop.f32.mrf.mxu1  ;;  %v2024_v30 = vmul.f32 %v5096_v38, %v1866_v18  ;;  %v5324_v18 = vrot.slane %v2483_v7, %v5260_v33  ;;  %v5341_v7 = vrot.slane %v2619_v28, %v5260_v33  ;;  %v2064_v17 = vadd.f32 %v5102_v10, %v2025_v11 }
 0x2ce   : > { %v1978_v57 = vpop.f32.mrf.mxu1  ;;  %v2063_v60 = vadd.f32 %v5102_v10, %v2024_v30 }
 0x2cf   : > { %v2040_v63 = vmul.f32 %v5096_v38, %v1978_v57  ;;  %v2109_v57 = vmax.f32 %v2077_v34, 0.0  ;;  %v2039_v34 = vmul.f32 %v5096_v38, %v5254_v0 }
 0x2d0   : > { %v2095_v14 = vmax.f32 %v2063_v60, 0.0  ;;  %v2041_v60 = vmul.f32 %v3141_v59, %v5096_v38  ;;  %v5372_v59 = vrot.slane %v2636_v52, %v5260_v33 }
 0x2d1   : > { %v2079_v51 = vadd.f32 %v5102_v10, %v2040_v63  ;;  %v2141_v45 = vmin.f32 %v2109_v57, 6.0 }
 0x2d2   : > { %v5327_v13 = vmin.f32 %v2095_v14, 6.0  ;;  %v2092_v14 = vmax.f32 %v2060_v2, 0.0  ;;  %v2080_v9 = vadd.f32 %v5102_v10, %v2041_v60 }
 0x2d3   : > { %v2111_v39 = vmax.f32 %v2079_v51, 0.0 }
 0x2d4   : > { %v2179_v61 = vcombine.low %v2123_v50, %v5327_v13  ;;  %v2180_v26 = vcombine.high %v2123_v50, %v5327_v13  ;;  %v2112_v11 = vmax.f32 %v2080_v9, 0.0  ;;  %v2140_v13 = vmin.f32 %v2108_v35, 6.0 }
 0x2d5   : > { %v2143_v32 = vmin.f32 %v2111_v39, 6.0 }
 0x2d6   : > { %v2187_v49 = vrot.slane %v2179_v61, %v5148_v46 }
 0x2d7   : > { %v2315_v19 = vcombine.low %v2139_v48, %v2143_v32  ;;  %v2316_v20 = vcombine.high %v2139_v48, %v2143_v32 }
 0x2d9   : > { %v3108_v44 = vpop.f32.mrf.mxu0  ;;  %v2323_v42 = vrot.slane %v2315_v19, %v5148_v46 }
 0x2da   : > { %v2026_v47 = vmul.f32 %v3108_v44, %v5096_v38  ;;  %v2096_v44 = vmax.f32 %v2064_v17, 0.0  ;;  %v2330_v17 = vrot.slane %v2316_v20, %v5148_v46 }
 0x2db   : > { %v1876_v31 = vpop.f32.mrf.mxu0 }
 0x2dc   : > { %v3144_v36 = vpop.f32.mrf.mxu1  ;;  %v2065_v29 = vadd.f32 %v5102_v10, %v2026_v47  ;;  %v2062_v47 = vadd.f32 %v5102_v10, %v2023_v12  ;;  %v2128_v31 = vmin.f32 %v2096_v44, 6.0 }
 0x2dd   : > { %v2042_v40 = vmul.f32 %v3144_v36, %v5096_v38 }
 0x2de   : > { %v1988_v25 = vpop.f32.mrf.mxu1  ;;  %v2097_v63 = vmax.f32 %v2065_v29, 0.0  ;;  %v2094_v32 = vmax.f32 %v2062_v47, 0.0 }
 0x2df   : > { %v2081_v30 = vadd.f32 %v5102_v10, %v2042_v40  ;;  %v2078_v40 = vadd.f32 %v5102_v10, %v2039_v34  ;;  %v2124_v25 = vmin.f32 %v2092_v14, 6.0 }
 0x2e0   : > { %v2129_v24 = vmin.f32 %v2097_v63, 6.0  ;;  %v2126_v35 = vmin.f32 %v2094_v32, 6.0 }
 0x2e1   : > { %v2113_v28 = vmax.f32 %v2081_v30, 0.0  ;;  %v2451_v19 = vcombine.low %v2124_v25, %v2128_v31 }
 0x2e2   : > { %v2195_v3 = vcombine.low %v2125_v1, %v2129_v24  ;;  %v2196_v52 = vcombine.high %v2125_v1, %v2129_v24 }
 0x2e3   : > { %v2145_v51 = vmin.f32 %v2113_v28, 6.0  ;;  %v2194_v28 = vrot.slane %v2180_v26, %v5148_v46 }
 0x2e4   : > { %v2203_v58 = vrot.slane %v2195_v3, %v5148_v46  ;;  %v2210_v57 = vrot.slane %v2196_v52, %v5148_v46  ;;  %v2452_v3 = vcombine.high %v2124_v25, %v2128_v31 }
 0x2e5   : > { %v2331_v39 = vcombine.low %v2141_v45, %v2145_v51  ;;  %v2332_v54 = vcombine.high %v2141_v45, %v2145_v51  ;;  %v2110_v45 = vmax.f32 %v2078_v40, 0.0  ;;  %v2144_v51 = vmin.f32 %v2112_v11, 6.0 }
 0x2e6   : > { %v2243_v36 = vcombine.low %v2187_v49, %v2203_v58  ;;  %v2244_v23 = vcombine.high %v2187_v49, %v2203_v58  ;;  %v2259_v14 = vcombine.low %v2194_v28, %v2210_v57  ;;  %v2466_v40 = vrot.slane %v2452_v3, %v5148_v46 }
 0x2e7   : > { %v2339_v0 = vrot.slane %v2331_v39, %v5148_v46  ;;  %v2346_v30 = vrot.slane %v2332_v54, %v5148_v46  ;;  %v2588_v47 = vcombine.high %v2140_v13, %v2144_v51 }
 0x2e8   : > { %v5391_v29 = vrot.slane %v2243_v36, %v5260_v33  ;;  %v2258_v1 = vrot.slane %v2244_v23, %v5260_v33  ;;  %v2142_v23 = vmin.f32 %v2110_v45, 6.0 }
 0x2e9   : > { %v2379_v4 = vcombine.low %v2323_v42, %v2339_v0  ;;  %v2380_v6 = vcombine.high %v2323_v42, %v2339_v0  ;;  %v3111_v63 = vpop.f32.mrf.mxu0  ;;  %v2395_v34 = vcombine.low %v2330_v17, %v2346_v30  ;;  %v2260_v42 = vcombine.high %v2194_v28, %v2210_v57 }
 0x2ea   : > { %v2276_v48 = vcombine.high %v5272_v53, %v5391_v29  ;;  %v2277_v9 = vcombine.low %v5280_v56, %v2258_v1  ;;  %v2275_v58 = vcombine.low %v5272_v53, %v5391_v29  ;;  %v2396_v52 = vcombine.high %v2330_v17, %v2346_v30 }
 0x2eb   : > { %v5396_v2 = vrot.slane %v2379_v4, %v5260_v33  ;;  %v1885_v60 = vpop.f32.mrf.mxu0  ;;  %v2394_v24 = vrot.slane %v2380_v6, %v5260_v33  ;;  %v2403_v20 = vrot.slane %v2395_v34, %v5260_v33  ;;  %v2267_v4 = vrot.slane %v2259_v14, %v5260_v33 }
 0x2ec   : > { %v3147_v50 = vpop.f32.mrf.mxu1  ;;  %v2027_v5 = vmul.f32 %v5096_v38, %v1885_v60  ;;  %2693 = vrot.lane.b32.xlu0 %v2276_v48, %s3314_s9  ;;  %v2459_v6 = vrot.slane %v2451_v19, %v5148_v46  ;;  %v2278_v31 = vcombine.high %v5280_v56, %v2258_v1  ;;  %v5425_v57 = vrot.slane %v2396_v52, %v5260_v33 }
 0x2ed   : > { %v2412_v61 = vcombine.high %v5292_v43, %v5396_v2  ;;  %v2411_v49 = vcombine.low %v5292_v43, %v5396_v2  ;;  %v2413_v0 = vcombine.low %v5298_v21, %v2394_v24  ;;  %v2414_v25 = vcombine.high %v5298_v21, %v2394_v24 }
 0x2ee   : > { %v1997_v12 = vpop.f32.mrf.mxu1  ;;  %v2066_v44 = vadd.f32 %v5102_v10, %v2027_v5  ;;  %v5428_v30 = vrot.slane %v2260_v42, %v5260_v33  ;;  %v2415_v56 = vcombine.low %v5311_v55, %v2403_v20  ;;  %v2279_v21 = vcombine.low %v5286_v8, %v2267_v4 }
 0x2ef   : > { %v2043_v39 = vmul.f32 %v5096_v38, %v1997_v12  ;;  %2695 = vrot.lane.b32.xlu1 %v2412_v61, %s3314_s9  ;;  %v2587_v38 = vcombine.low %v2140_v13, %v2144_v51  ;;  %v2602_v13 = vrot.slane %v2588_v47, %v5148_v46  ;;  %v2416_v60 = vcombine.high %v5311_v55, %v2403_v20 }
 0x2f0   : > { %v2098_v36 = vmax.f32 %v2066_v44, 0.0  ;;  %2701 = vrot.lane.b32.xlu0 %v2277_v9, %s3319_s11  ;;  %v2280_v61 = vcombine.high %v5286_v8, %v2267_v4  ;;  %v2417_v19 = vcombine.low %v5317_v62, %v5425_v57  ;;  %v2281_v51 = vcombine.low %v5304_v41, %v5428_v30 }
 0x2f1   : > { %v2082_v54 = vadd.f32 %v5102_v10, %v2043_v39  ;;  %v2595_v63 = vrot.slane %v2587_v38, %v5148_v46 }
 0x2f2   : > { %v2130_v10 = vmin.f32 %v2098_v36, 6.0 }
 0x2f3   : > { %v2114_v26 = vmax.f32 %v2082_v54, 0.0  ;;  %2703 = vrot.lane.b32.xlu1 %v2413_v0, %s3319_s11  ;;  %s204_s11 = scalar_lea.vmem [#allocation3], %s2952_s10 }
 0x2f4   : > { %v2467_v32 = vcombine.low %v2126_v35, %v2130_v10  ;;  %v2468_v50 = vcombine.high %v2126_v35, %v2130_v10  ;;  %2709 = vrot.lane.b32.xlu0 %v2278_v31, %s3316_s5 }
 0x2f5   : > { %v2146_v11 = vmin.f32 %v2114_v26, 6.0 }
 0x2f6   : > { %v2475_v1 = vrot.slane %v2467_v32, %v5148_v46  ;;  %v2482_v17 = vrot.slane %v2468_v50, %v5148_v46 }
 0x2f7   : > { %v2603_v48 = vcombine.low %v2142_v23, %v2146_v11  ;;  %v2604_v28 = vcombine.high %v2142_v23, %v2146_v11  ;;  %2711 = vrot.lane.b32.xlu1 %v2414_v25, %s3316_s5  ;;  %v2418_v25 = vcombine.high %v5317_v62, %v5425_v57  ;;  %s3329_s5 = smov 104  }
 0x2f8   : > { %v2515_v5 = vcombine.low %v2459_v6, %v2475_v1  ;;  %v2516_v12 = vcombine.high %v2459_v6, %v2475_v1  ;;  %v2531_v3 = vcombine.low %v2466_v40, %v2482_v17  ;;  %v2532_v14 = vcombine.high %v2466_v40, %v2482_v17  ;;  %2717 = vrot.lane.b32.xlu0 %v2279_v21, %s3320_s12 }
 0x2f9   : > { %v2611_v24 = vrot.slane %v2603_v48, %v5148_v46  ;;  %v2618_v45 = vrot.slane %v2604_v28, %v5148_v46 }
 0x2fa   : > { %v2523_v44 = vrot.slane %v2515_v5, %v5260_v33  ;;  %v2530_v46 = vrot.slane %v2516_v12, %v5260_v33  ;;  %v2539_v9 = vrot.slane %v2531_v3, %v5260_v33  ;;  %v2546_v42 = vrot.slane %v2532_v14, %v5260_v33 }
 0x2fb   : > { %v2651_v34 = vcombine.low %v2595_v63, %v2611_v24  ;;  %v2652_v55 = vcombine.high %v2595_v63, %v2611_v24  ;;  %v2667_v39 = vcombine.low %v2602_v13, %v2618_v45  ;;  %v2668_v8 = vcombine.high %v2602_v13, %v2618_v45  ;;  %2719 = vrot.lane.b32.xlu1 %v2415_v56, %s3320_s12  ;;  %s2872_s12 = sshll.u32 %s204_s11, 4  ;;  %s5488_s12 = int_to_ptr.vmem [resolvable:$true] %s2872_s12 }
 0x2fc   : > { %2725 = vrot.lane.b32.xlu0 %v2280_v61, %s3321_s13  ;;  %v2547_v38 = vcombine.low %v5324_v18, %v2523_v44  ;;  %v2548_v47 = vcombine.high %v5324_v18, %v2523_v44  ;;  %v2549_v36 = vcombine.low %v5334_v37, %v2530_v46  ;;  %v2550_v23 = vcombine.high %v5334_v37, %v2530_v46 }
 0x2fd   : > { %v2659_v52 = vrot.slane %v2651_v34, %v5260_v33  ;;  %v2666_v54 = vrot.slane %v2652_v55, %v5260_v33  ;;  %v2675_v0 = vrot.slane %v2667_v39, %v5260_v33  ;;  %v2682_v35 = vrot.slane %v2668_v8, %v5260_v33 }
 0x2fe   : > { %v2551_v40 = vcombine.low %v5363_v22, %v2539_v9  ;;  %v2552_v18 = vcombine.high %v5363_v22, %v2539_v9  ;;  %v2553_v37 = vcombine.low %v5380_v15, %v2546_v42 }
 0x2ff   : > { %2727 = vrot.lane.b32.xlu1 %v2416_v60, %s3321_s13  ;;  %v2683_v26 = vcombine.low %v5341_v7, %v2659_v52  ;;  %v2684_v20 = vcombine.high %v5341_v7, %v2659_v52  ;;  %v2685_v4 = vcombine.low %v5347_v16, %v2666_v54  ;;  %v2686_v6 = vcombine.high %v5347_v16, %v2666_v54  ;;  %s3012_s13 = sshll.u32 %s3302_s18, 8  ;;  %s5497_s18 = scalar_lea.sflag [#allocation4], %s202_s8 }
 0x300   : > { %v2687_v33 = vcombine.low %v5353_v27, %v2675_v0  ;;  %v2688_v10 = vcombine.high %v5353_v27, %v2675_v0  ;;  %v2689_v31 = vcombine.low %v5372_v59, %v2682_v35  ;;  %v2690_v11 = vcombine.high %v5372_v59, %v2682_v35  ;;  %2733 = vrot.lane.b32.xlu0 %v2281_v51, %s3322_s14 }
 0x301   : > { %v2554_v7 = vcombine.high %v5380_v15, %v2546_v42  ;;  %v2282_v16 = vcombine.high %v5304_v41, %v5428_v30 }
 0x303   : > { %2735 = vrot.lane.b32.xlu1 %v2417_v19, %s3322_s14 }
 0x304   : > { %2741 = vrot.lane.b32.xlu0 %v2282_v16, %s3323_s21 }
 0x307   : > { %2743 = vrot.lane.b32.xlu1 %v2418_v25, %s3323_s21 }
 0x308   : > { %2749 = vrot.lane.b32.xlu0 %v2547_v38, %s3324_s22 }
 0x30b   : > { %2751 = vrot.lane.b32.xlu1 %v2683_v26, %s3324_s22  ;;  %s5493_s22 = scalar_lea.hbm %s5547_s4, %s3012_s13 }
 0x30c   : > { %2757 = vrot.lane.b32.xlu0 %v2548_v47, %s3325_s24 }
 0x30f   : > { %2759 = vrot.lane.b32.xlu1 %v2684_v20, %s3325_s24  ;;  %s3234_s24 = scalar_lea.vmem %s5488_s12, 256 }
 0x310   : > { %2765 = vrot.lane.b32.xlu0 %v2549_v36, %s3326_s26  ;;  %p3235_p12 = scmp.ne.s32.totalorder %s5488_s12, %s3234_s24 }
 0x312   : > { %p3236_p13 = pnand %p3235_p12, %p3399_p4 }
 0x313   : > { %2767 = vrot.lane.b32.xlu1 %v2685_v4, %s3326_s26  ;;  %s3332_s26 = smov [#allocation3]  }
 0x314   : > { %2773 = vrot.lane.b32.xlu0 %v2550_v23, %s3327_s29  ;;  %p3237_p0 = pneg %p3236_p13 }
 0x317   : > { %2775 = vrot.lane.b32.xlu1 %v2686_v6, %s3327_s29  ;;  %s3238_s29 = sshll.u32 %s3332_s26, 4  ;;  %s3239_s29 = int_to_ptr.vmem [resolvable:$false] %s3238_s29 }
 0x318   : > { %2781 = vrot.lane.b32.xlu0 %v2551_v40, %s3328_s30  ;;  %p3241_p1 = scmp.lt.s32.totalorder %s5488_s12, %s3239_s29 }
 0x31b   : > { %2783 = vrot.lane.b32.xlu1 %v2687_v33, %s3328_s30  ;;  %s3240_s30 = scalar_lea.vmem %s3239_s29, 512 }
 0x31c   : > { %2789 = vrot.lane.b32.xlu0 %v2552_v18, %s3329_s5  ;;  %p3242_p2 = scmp.lt.s32.totalorder %s3240_s30, %s3234_s24 }
 0x31e   : > { %p3243_p3 = por %p3242_p2, %p3241_p1 }
 0x31f   : > { %2791 = vrot.lane.b32.xlu1 %v2688_v10, %s3329_s5 }
 0x320   : > { %2797 = vrot.lane.b32.xlu0 %v2553_v37, %s3330_s6  ;;  %p3244_p5 = pnand %p3243_p3, %p3237_p0 }
 0x323   : > { %2799 = vrot.lane.b32.xlu1 %v2689_v31, %s3330_s6 }
 0x324   : > { %2805 = vrot.lane.b32.xlu0 %v2554_v7, %s3331_s7 }
 0x327   : > { %2807 = vrot.lane.b32.xlu1 %v2690_v11, %s3331_s7 }
 0x35e   : > { %v2694_v41 = vpop.permute.xlu0 %2693 }
 0x35f   : > { %v2811_v19 = vsel %vm1070_vm4, %v2275_v58, %v2694_v41 }
 0x361   : > { %v2696_v62 = vpop.permute.xlu1 %2695 }
 0x362   : > { %v2702_v27 = vpop.permute.xlu0 %2701  ;;  %v2812_v51 = vsel %vm1070_vm4, %v2411_v49, %v2696_v62  ;;  %vm2851_vm4 = vcmask 982016  }
 0x363   : > { %v2814_v5 = vsel %vm2813_vm8, %v2811_v19, %v2702_v27 }
 0x365   : > { %v2704_v22 = vpop.permute.xlu1 %2703 }
 0x366   : > { %v2710_v59 = vpop.permute.xlu0 %2709  ;;  %v2815_v3 = vsel %vm2813_vm8, %v2812_v51, %v2704_v22 }
 0x367   : > { %v2816_v14 = vsel %vm1513_vm6, %v2814_v5, %v2710_v59 }
 0x369   : > { %v2712_v15 = vpop.permute.xlu1 %2711 }
 0x36a   : > { %v2718_v57 = vpop.permute.xlu0 %2717  ;;  %v2817_v53 = vsel %vm1513_vm6, %v2815_v3, %v2712_v15 }
 0x36b   : > { %v2819_v29 = vsel %vm2818_vm9, %v2816_v14, %v2718_v57 }
 0x36d   : > { %v2720_v30 = vpop.permute.xlu1 %2719 }
 0x36e   : > { %v2726_v63 = vpop.permute.xlu0 %2725  ;;  %v2820_v58 = vsel %vm2818_vm9, %v2817_v53, %v2720_v30 }
 0x36f   : > { %v2822_v55 = vsel %vm2821_vm10, %v2819_v29, %v2726_v63 }
 0x371   : > { %v2728_v13 = vpop.permute.xlu1 %2727 }
 0x372   : > { %v2734_v32 = vpop.permute.xlu0 %2733  ;;  %v2823_v43 = vsel %vm2821_vm10, %v2820_v58, %v2728_v13 }
 0x373   : > { %v2825_v2 = vsel %vm2824_vm11, %v2822_v55, %v2734_v32 }
 0x375   : > { %v2736_v50 = vpop.permute.xlu1 %2735 }
 0x376   : > { %v2742_v48 = vpop.permute.xlu0 %2741  ;;  %v2826_v39 = vsel %vm2824_vm11, %v2823_v43, %v2736_v50 }
 0x377   : > { %v2828_v8 = vsel %vm2827_vm12, %v2825_v2, %v2742_v48 }
 0x379   : > { %v2744_v28 = vpop.permute.xlu1 %2743 }
 0x37a   : > { %v2750_v56 = vpop.permute.xlu0 %2749  ;;  %v2829_v46 = vsel %vm2827_vm12, %v2826_v39, %v2744_v28 }
 0x37b   : > { %v2831_v9 = vsel %vm2830_vm13, %v2828_v8, %v2750_v56 }
 0x37d   : > { %v2752_v21 = vpop.permute.xlu1 %2751 }
 0x37e   : > { %v2758_v1 = vpop.permute.xlu0 %2757  ;;  %v2832_v42 = vsel %vm2830_vm13, %v2829_v46, %v2752_v21 }
 0x37f   : > { %v2834_v52 = vsel %vm2833_vm14, %v2831_v9, %v2758_v1 }
 0x381   : > { %v2760_v17 = vpop.permute.xlu1 %2759 }
 0x382   : > { %v2766_v60 = vpop.permute.xlu0 %2765  ;;  %v2835_v54 = vsel %vm2833_vm14, %v2832_v42, %v2760_v17 }
 0x383   : > { %v2837_v0 = vsel %vm2836_vm15, %v2834_v52, %v2766_v60 }
 0x385   : > { %v2768_v61 = vpop.permute.xlu1 %2767 }
 0x386   : > { %v2774_v24 = vpop.permute.xlu0 %2773  ;;  %v2838_v38 = vsel %vm2836_vm15, %v2835_v54, %v2768_v61 }
 0x387   : > { %v2840_v47 = vsel %vm2839_vm0, %v2837_v0, %v2774_v24 }
 0x389   : > { %v2776_v45 = vpop.permute.xlu1 %2775 }
 0x38a   : > { %v2782_v12 = vpop.permute.xlu0 %2781  ;;  %v2841_v23 = vsel %vm2839_vm0, %v2838_v38, %v2776_v45 }
 0x38b   : > { %v2843_v26 = vsel %vm2842_vm1, %v2840_v47, %v2782_v12 }
 0x38d   : > { %v2784_v34 = vpop.permute.xlu1 %2783 }
 0x38e   : > { %v2790_v49 = vpop.permute.xlu0 %2789  ;;  %v2844_v20 = vsel %vm2842_vm1, %v2841_v23, %v2784_v34 }
 0x38f   : > { %v2846_v4 = vsel %vm2845_vm2, %v2843_v26, %v2790_v49 }
 0x391   : > { %v2792_v44 = vpop.permute.xlu1 %2791 }
 0x392   : > { %v2798_v35 = vpop.permute.xlu0 %2797  ;;  %v2847_v6 = vsel %vm2845_vm2, %v2844_v20, %v2792_v44 }
 0x393   : > { %v2849_v33 = vsel %vm2848_vm3, %v2846_v4, %v2798_v35 }
 0x395   : > { %v2800_v36 = vpop.permute.xlu1 %2799 }
 0x396   : > { %v2806_v40 = vpop.permute.xlu0 %2805  ;;  %v2850_v10 = vsel %vm2848_vm3, %v2847_v6, %v2800_v36 }
 0x397   : > { %v2852_v31 = vsel %vm2851_vm4, %v2849_v33, %v2806_v40 }
 0x398   : > { %2854 = vst [vmem:[%s204_s11] sm:$0xff] %v2852_v31 }
 0x399   : > { %v2808_v18 = vpop.permute.xlu1 %2807 }
 0x39a   : > { %v2853_v37 = vsel %vm2851_vm4, %v2850_v10, %v2808_v18 }
 0x39b   : > { %2855 = vst [vmem:[%s204_s11 + $0x8] sm:$0xff] %v2853_v37 }
 0x39c   : > { %3247 = shalt.err (!%p3244_p5)
}
 0x39d   : > { %s3248_s5 = scalar_lea.hbm %s5493_s22, 256  ;;  %s3252_s8 = scalar_lea.hbm %s5547_s4, 512 }
 0x39e   : > { %p3249_p6 = scmp.ne.s32.totalorder %s5493_s22, %s3248_s5  ;;  %p3253_p10 = scmp.lt.s32.totalorder %s5493_s22, %s5547_s4 }
 0x39f   : > { %p3254_p11 = scmp.lt.s32.totalorder %s3252_s8, %s3248_s5 }
 0x3a0   : > { %p3250_p7 = pnand %p3249_p6, %p3399_p4 }
 0x3a1   : > { %p3255_p12 = por %p3254_p11, %p3253_p10 }
 0x3a2   : > { %p3251_p9 = pneg %p3250_p7 }
 0x3a4   : > { %p3256_p13 = pnand %p3255_p12, %p3251_p9 }
 0x3a6   : > { %3259 = shalt.err (!%p3256_p13)
}
 0x3a7   : > { %s3333_s13 = smov 128  }
 0x3a8   : > { %3158 = dma.vmem_to_hbm [thread:$0]  (%p3399_p4), %s5488_s12, 256, %s5493_s22, %s5497_s18, %s3333_s13, %s3333_s13, %s3314_s9  }
 0x3a9 PF: > { %p3164_p0 = scmp.ge.s32.totalorder %s3310_s20, 2  ;;  %s2887_s14 = sand.u32 1, %s3290_s15  }
 0x3aa   : > { %s2888_s21 = scalar_lea.sflag [#allocation4], %s2887_s14 }
 0x3ab   : > { %p3161_p1 = pnand %p3164_p0, %p3406_p8 }
 0x3ad   : > { %p3162_p2 = pneg %p3161_p1 }
 0x3af   : > { %3285 = dma.done.wait (%p3162_p2), %s2888_s21, 256  }
 0x3b0   : > { %3287 = vsyncadd (%p3162_p2), %s2888_s21, 4294967040  ;;  %s17_s20 = sadd.s32 1, %s3310_s20   ;;  %s5799_s15 = smov %s3294_s16 }
 0x3b1   : > { %p14_p3 = scmp.ge.s32.totalorder %s17_s20, 4   ;;  %s5800_s16 = smov %s3298_s17 }
 0x3b2   : > { %s5801_s17 = smov %s3412_s28  ;;  %s5802_s18 = smov %s3306_s19 }
 0x3b3   : > { %s5803_s19 = smov %s5805_s23  ;;  %16 = sbr.rel (!%p14_p3) target bundleno = 4 (0x4), region = 78 }
 0x3b8   :  { %2893 = vsyncpa [#allocation4], 1 }
 0x3b9   :  { %2895 = vsyncpa [#allocation4 + $0x1], 1 }

</bundles_post_ra>
